<compile_context>
chip_gen: v5e
topology: v5e:2x2
jax: 0.10.0
libtpu: 0.0.40
codegen_flags: <defaults>
</compile_context>

<pallas_src>
import functools

import jax
import jax.numpy as jnp
from jax.experimental import pallas as pl
from jax.experimental.pallas import tpu as pltpu


HIDDEN = 256


def _round_up(n, m):
    return ((n + m - 1) // m) * m


def _pick_tm(batch, d_in):
    """Batch-tile size: multiple of 16 (bf16-friendly sublanes), <= 512,
    capped so the double-buffered f32 x tile stays <= ~8 MiB of VMEM, and
    chosen to give >= 2 grid steps (v7x dual-TC) whenever batch > one tile."""
    b16 = _round_up(batch, 16)
    vmem_cap = max(16, (((8 << 20) // (2 * 4 * d_in)) // 16) * 16)
    tm = min(512, vmem_cap, _round_up((b16 + 1) // 2, 16))
    return max(tm, 16)


def _mlp_kernel(x_ref, w1_ref, b1_ref, w2_ref, b2_ref, w3_ref, b3_ref, o_ref):
    """Fused 3-layer MLP on one batch tile: Linear->ReLU->Linear->ReLU->Linear.

    x arrives f32 and is cast to bf16 in-kernel (VPU work hidden under the
    DMA/MXU); all three matmuls use bf16 operands with f32 MXU accumulation;
    biases are added in f32.
    """
    x = x_ref[...].astype(jnp.bfloat16)  # (TM, D_in)
    h1 = jnp.dot(x, w1_ref[...], preferred_element_type=jnp.float32) + b1_ref[...]
    h1 = jnp.maximum(h1, 0.0).astype(jnp.bfloat16)
    h2 = jnp.dot(h1, w2_ref[...], preferred_element_type=jnp.float32) + b2_ref[...]
    h2 = jnp.maximum(h2, 0.0).astype(jnp.bfloat16)
    y = jnp.dot(h2, w3_ref[...], preferred_element_type=jnp.float32) + b3_ref[...]
    o_ref[...] = y.astype(o_ref.dtype)


def prepare_params(params):
    """One-time packing (call OUTSIDE the per-step path): cast weights to
    bf16, keep biases f32, pad the final layer to a lane-dense 128-wide
    output so the kernel's stores are unmasked."""
    w1, b1, w2, b2, w3, b3 = params
    num_classes = w3.shape[1]
    hidden = w1.shape[1]
    out_pad = _round_up(num_classes, 128)

    w1_b = w1.astype(jnp.bfloat16)
    w2_b = w2.astype(jnp.bfloat16)
    w3_b = jnp.zeros((hidden, out_pad), jnp.bfloat16).at[:, :num_classes].set(
        w3.astype(jnp.bfloat16))
    b1_f = b1.reshape(1, -1).astype(jnp.float32)
    b2_f = b2.reshape(1, -1).astype(jnp.float32)
    b3_f = jnp.zeros((1, out_pad), jnp.float32).at[:, :num_classes].set(
        b3.reshape(1, -1).astype(jnp.float32))

    packed = (w1_b, b1_f, w2_b, b2_f, w3_b, b3_f)
    return packed, num_classes


@functools.partial(jax.jit, static_argnames=("num_classes",))
def fully_connected_forward(x, packed_params, num_classes):
    """x: (B, C, H, W) float32. Returns logits (B, num_classes) float32."""
    w1, b1, w2, b2, w3, b3 = packed_params
    B = x.shape[0]
    x2d = x.reshape(B, -1)              # x.view(x.size(0), -1); stays f32, no copy
    d_in = x2d.shape[1]
    hidden = w1.shape[1]
    out_pad = w3.shape[1]

    # ---- tiling (all static): no batch padding, Pallas clips the last block ----
    tm = _pick_tm(B, d_in)
    grid = (pl.cdiv(B, tm),)

    # ---- cost estimate (hygiene for XLA scheduling around the custom call) ----
    flops = 2 * B * (d_in * hidden + hidden * hidden + hidden * out_pad)
    bytes_accessed = (
        x2d.size * 4                                   # f32 activations in
        + w1.size * 2 + w2.size * 2 + w3.size * 2      # bf16 weights
        + b1.size * 4 + b2.size * 4 + b3.size * 4      # f32 biases
        + B * out_pad * 4)                             # f32 logits out
    cost = pl.CostEstimate(flops=flops, transcendentals=0,
                           bytes_accessed=bytes_accessed)

    # x / out are tiled over the batch grid axis; weights & biases use a
    # constant block index so they stay resident in VMEM across the grid.
    batch_spec = lambda cols: pl.BlockSpec((tm, cols), lambda i: (i, 0))
    const_spec = lambda shape: pl.BlockSpec(shape, lambda i: (0, 0))

    out = pl.pallas_call(
        _mlp_kernel,
        out_shape=jax.ShapeDtypeStruct((B, out_pad), jnp.float32),
        grid_spec=pltpu.PrefetchScalarGridSpec(
            num_scalar_prefetch=0,
            grid=grid,
            in_specs=[
                batch_spec(d_in),                 # x tile (f32, cast in kernel)
                const_spec((d_in, hidden)),       # w1
                const_spec((1, hidden)),          # b1
                const_spec((hidden, hidden)),     # w2
                const_spec((1, hidden)),          # b2
                const_spec((hidden, out_pad)),    # w3 (lane-padded)
                const_spec((1, out_pad)),         # b3 (lane-padded)
            ],
            out_specs=batch_spec(out_pad),
        ),
        compiler_params=pltpu.CompilerParams(
            dimension_semantics=("parallel",),
            vmem_limit_bytes=32 << 20,
        ),
        cost_estimate=cost,
    )(x2d, w1, b1, w2, b2, w3, b3)

    return out[:, :num_classes]


def init_params(key, input_size, num_classes):
    """Deterministic init mirroring nn.Linear's default uniform(-1/sqrt(fan_in), +)."""
    def linear_init(k, fan_in, fan_out):
        kw, kb = jax.random.split(k)
        bound = 1.0 / jnp.sqrt(fan_in)
        w = jax.random.uniform(kw, (fan_in, fan_out), jnp.float32, -bound, bound)
        b = jax.random.uniform(kb, (1, fan_out), jnp.float32, -bound, bound)
        return w, b

    k1, k2, k3 = jax.random.split(key, 3)
    w1, b1 = linear_init(k1, input_size, HIDDEN)
    w2, b2 = linear_init(k2, HIDDEN, HIDDEN)
    w3, b3 = linear_init(k3, HIDDEN, num_classes)
    return (w1, b1, w2, b2, w3, b3)


if __name__ == "__main__":
    key = jax.random.PRNGKey(0)
    k_x, k_p = jax.random.split(key)

    # Small shapes consistent with the module: NCHW input flattened to input_size.
    B, C, H, W = 2, 4, 16, 16
    input_size = C * H * W          # 1024
    num_classes = 10

    x = jax.random.normal(k_x, (B, C, H, W), jnp.float32)
    params = init_params(k_p, input_size, num_classes)
    packed, nc = prepare_params(params)   # one-time packing, outside the hot path

    y = fully_connected_forward(x, packed, num_classes=nc)
    jax.block_until_ready(y)
    assert y.shape == (B, num_classes)
    assert y.dtype == jnp.float32

    # Reference in plain JAX with matched bf16 quantization of operands
    # (kernel uses bf16 inputs/weights with f32 accumulation).
    w1, b1, w2, b2, w3, b3 = params
    f32 = lambda a: a.astype(jnp.bfloat16).astype(jnp.float32)
    x2d = f32(x.reshape(B, -1))
    ref = jnp.maximum(x2d @ f32(w1) + b1, 0.0)
    ref = jnp.maximum(f32(ref) @ f32(w2) + b2, 0.0)
    ref = f32(ref) @ f32(w3) + b3
    assert jnp.allclose(y, ref, atol=2e-2, rtol=2e-2), (
        f"max abs err {jnp.max(jnp.abs(y - ref))}")

    print("KERNEL_OK")
</pallas_src>

<mosaic_0001>
module attributes {stable_mosaic.version = 11 : i64} {
  func.func @_mlp_kernel(%arg0: i32, %arg1: memref<16x1024xf32, #tpu.memory_space<vmem>>, %arg2: memref<1024x256xbf16, #tpu.memory_space<vmem>>, %arg3: memref<1x256xf32, #tpu.memory_space<vmem>>, %arg4: memref<256x256xbf16, #tpu.memory_space<vmem>>, %arg5: memref<1x256xf32, #tpu.memory_space<vmem>>, %arg6: memref<256x128xbf16, #tpu.memory_space<vmem>>, %arg7: memref<1x128xf32, #tpu.memory_space<vmem>>, %arg8: memref<16x128xf32, #tpu.memory_space<vmem>>) attributes {dimension_semantics = [#tpu.dimension_semantics<parallel>], iteration_bounds = array<i64: 1>, scalar_prefetch = 0 : i64, scratch_operands = 0 : i64, tpu.core_type = #tpu.core_type<tc>, window_params = [{transform_indices = @transform_0, window_bounds = array<i64: 16, 1024>}, {pipeline_mode = #tpu.pipeline_mode<synchronous>, transform_indices = @transform_1, window_bounds = array<i64: 1024, 256>}, {pipeline_mode = #tpu.pipeline_mode<synchronous>, transform_indices = @transform_2, window_bounds = array<i64: 1, 256>}, {pipeline_mode = #tpu.pipeline_mode<synchronous>, transform_indices = @transform_3, window_bounds = array<i64: 256, 256>}, {pipeline_mode = #tpu.pipeline_mode<synchronous>, transform_indices = @transform_4, window_bounds = array<i64: 1, 256>}, {pipeline_mode = #tpu.pipeline_mode<synchronous>, transform_indices = @transform_5, window_bounds = array<i64: 256, 128>}, {pipeline_mode = #tpu.pipeline_mode<synchronous>, transform_indices = @transform_6, window_bounds = array<i64: 1, 128>}, {transform_indices = @transform_7, window_bounds = array<i64: 16, 128>}]} {
    %c0 = arith.constant 0 : index
    %c0_0 = arith.constant 0 : index
    %0 = vector.load %arg1[%c0, %c0_0] : memref<16x1024xf32, #tpu.memory_space<vmem>>, vector<16x1024xf32>
    %1 = arith.truncf %0 : vector<16x1024xf32> to vector<16x1024xbf16>
    %c0_1 = arith.constant 0 : index
    %c0_2 = arith.constant 0 : index
    %2 = vector.load %arg2[%c0_1, %c0_2] : memref<1024x256xbf16, #tpu.memory_space<vmem>>, vector<1024x256xbf16>
    %cst = arith.constant dense<0.000000e+00> : vector<16x256xf32>
    %3 = tpu.matmul %1, %2, %cst {dimension_numbers = #tpu.dot_dimension_numbers<[1], [0], [0], [1], [0, 0, 1, 1], [], []>} : vector<16x1024xbf16>, vector<1024x256xbf16>, vector<16x256xf32> -> vector<16x256xf32>
    %c0_3 = arith.constant 0 : index
    %c0_4 = arith.constant 0 : index
    %4 = vector.load %arg3[%c0_3, %c0_4] : memref<1x256xf32, #tpu.memory_space<vmem>>, vector<1x256xf32>
    %5 = vector.broadcast %4 : vector<1x256xf32> to vector<16x256xf32>
    %6 = arith.addf %3, %5 : vector<16x256xf32>
    %cst_5 = arith.constant 0.000000e+00 : f32
    %7 = vector.broadcast %cst_5 : f32 to vector<16x256xf32>
    %8 = arith.maximumf %6, %7 : vector<16x256xf32>
    %9 = arith.truncf %8 : vector<16x256xf32> to vector<16x256xbf16>
    %c0_6 = arith.constant 0 : index
    %c0_7 = arith.constant 0 : index
    %10 = vector.load %arg4[%c0_6, %c0_7] : memref<256x256xbf16, #tpu.memory_space<vmem>>, vector<256x256xbf16>
    %cst_8 = arith.constant dense<0.000000e+00> : vector<16x256xf32>
    %11 = tpu.matmul %9, %10, %cst_8 {dimension_numbers = #tpu.dot_dimension_numbers<[1], [0], [0], [1], [0, 0, 1, 1], [], []>} : vector<16x256xbf16>, vector<256x256xbf16>, vector<16x256xf32> -> vector<16x256xf32>
    %c0_9 = arith.constant 0 : index
    %c0_10 = arith.constant 0 : index
    %12 = vector.load %arg5[%c0_9, %c0_10] : memref<1x256xf32, #tpu.memory_space<vmem>>, vector<1x256xf32>
    %13 = vector.broadcast %12 : vector<1x256xf32> to vector<16x256xf32>
    %14 = arith.addf %11, %13 : vector<16x256xf32>
    %cst_11 = arith.constant 0.000000e+00 : f32
    %15 = vector.broadcast %cst_11 : f32 to vector<16x256xf32>
    %16 = arith.maximumf %14, %15 : vector<16x256xf32>
    %17 = arith.truncf %16 : vector<16x256xf32> to vector<16x256xbf16>
    %c0_12 = arith.constant 0 : index
    %c0_13 = arith.constant 0 : index
    %18 = vector.load %arg6[%c0_12, %c0_13] : memref<256x128xbf16, #tpu.memory_space<vmem>>, vector<256x128xbf16>
    %cst_14 = arith.constant dense<0.000000e+00> : vector<16x128xf32>
    %19 = tpu.matmul %17, %18, %cst_14 {dimension_numbers = #tpu.dot_dimension_numbers<[1], [0], [0], [1], [0, 0, 1, 1], [], []>} : vector<16x256xbf16>, vector<256x128xbf16>, vector<16x128xf32> -> vector<16x128xf32>
    %c0_15 = arith.constant 0 : index
    %c0_16 = arith.constant 0 : index
    %20 = vector.load %arg7[%c0_15, %c0_16] : memref<1x128xf32, #tpu.memory_space<vmem>>, vector<1x128xf32>
    %21 = vector.broadcast %20 : vector<1x128xf32> to vector<16x128xf32>
    %22 = arith.addf %19, %21 : vector<16x128xf32>
    %c0_17 = arith.constant 0 : index
    %c0_18 = arith.constant 0 : index
    %23 = vector.load %arg8[%c0_17, %c0_18] : memref<16x128xf32, #tpu.memory_space<vmem>>, vector<16x128xf32>
    tpu.vector_store %arg8[%c0_17, %c0_18], %22 {strides = array<i32>} : memref<16x128xf32, #tpu.memory_space<vmem>>, vector<16x128xf32>,
    return
  }
  func.func @transform_0(%arg0: i32) -> (i32, i32) {
    %c0_i32 = arith.constant 0 : i32
    %c0_i32_0 = arith.constant 0 : i32
    return %arg0, %c0_i32 : i32, i32
  }
  func.func @transform_1(%arg0: i32) -> (i32, i32) {
    %c0_i32 = arith.constant 0 : i32
    %c0_i32_0 = arith.constant 0 : i32
    %c0_i32_1 = arith.constant 0 : i32
    return %c0_i32, %c0_i32_0 : i32, i32
  }
  func.func @transform_2(%arg0: i32) -> (i32, i32) {
    %c0_i32 = arith.constant 0 : i32
    %c0_i32_0 = arith.constant 0 : i32
    %c0_i32_1 = arith.constant 0 : i32
    return %c0_i32, %c0_i32_0 : i32, i32
  }
  func.func @transform_3(%arg0: i32) -> (i32, i32) {
    %c0_i32 = arith.constant 0 : i32
    %c0_i32_0 = arith.constant 0 : i32
    %c0_i32_1 = arith.constant 0 : i32
    return %c0_i32, %c0_i32_0 : i32, i32
  }
  func.func @transform_4(%arg0: i32) -> (i32, i32) {
    %c0_i32 = arith.constant 0 : i32
    %c0_i32_0 = arith.constant 0 : i32
    %c0_i32_1 = arith.constant 0 : i32
    return %c0_i32, %c0_i32_0 : i32, i32
  }
  func.func @transform_5(%arg0: i32) -> (i32, i32) {
    %c0_i32 = arith.constant 0 : i32
    %c0_i32_0 = arith.constant 0 : i32
    %c0_i32_1 = arith.constant 0 : i32
    return %c0_i32, %c0_i32_0 : i32, i32
  }
  func.func @transform_6(%arg0: i32) -> (i32, i32) {
    %c0_i32 = arith.constant 0 : i32
    %c0_i32_0 = arith.constant 0 : i32
    %c0_i32_1 = arith.constant 0 : i32
    return %c0_i32, %c0_i32_0 : i32, i32
  }
  func.func @transform_7(%arg0: i32) -> (i32, i32) {
    %c0_i32 = arith.constant 0 : i32
    %c0_i32_0 = arith.constant 0 : i32
    return %arg0, %c0_i32 : i32, i32
  }
}

</mosaic_0001>

<bundles_post_ra>
// kernel: fully_connected_forward.1
= control target key start
LH: loop header
LB: loop body
LE: loop exit
PB: predicated region body
PF: predicated region fallthrough
CT: control target
= control target key end

     0   :  { %12 = vsyncpa [#allocation3], 0  ;;  %s2772_s0 = inlined_call_operand.vmem [shape: f32[2,1024], index: 0, kind: input, shape index: {}]   ;;  %s2773_s1 = inlined_call_operand.hbm [shape: bf16[1024,256], index: 1, kind: input, shape index: {}]   ;;  %s2774_s2 = inlined_call_operand.vmem [shape: f32[1,256], index: 2, kind: input, shape index: {}]   ;;  %s2775_s3 = inlined_call_operand.hbm [shape: bf16[256,256], index: 3, kind: input, shape index: {}]   ;;  %s2776_s4 = inlined_call_operand.vmem [shape: f32[1,256], index: 4, kind: input, shape index: {}]   ;;  %s2777_s5 = inlined_call_operand.vmem [shape: bf16[256,128], index: 5, kind: input, shape index: {}]   ;;  %s2778_s6 = inlined_call_operand.vmem [shape: f32[1,128], index: 6, kind: input, shape index: {}]   ;;  %s2779_s7 = inlined_call_operand.hbm [shape: f32[2,128], index: 7, kind: output, shape index: {}]  }
   0x1   :  { %13 = vsyncpa [#allocation6], 0 }
   0x2   :  { %14 = vsyncpa [#allocation4], 0  ;;  %s21_s26 = sshll.u32 %s2773_s1, 4  ;;  %s2566_s27 = smov [#allocation2]   ;;  %s22_s26 = int_to_ptr.hbm [resolvable:$true] %s21_s26 }
   0x3   :  { %s23_s28 = sshll.u32 %s2566_s27, 4  ;;  %s36_s8 = sshll.u32 %s2775_s3, 4  ;;  %s24_s28 = int_to_ptr.vmem [resolvable:$true] %s23_s28  ;;  %s37_s8 = int_to_ptr.hbm [resolvable:$true] %s36_s8 }
   0x4   :  { %s2567_s9 = smov 128   ;;  %s2568_s10 = smov 8  }
   0x5   :  { %29 = dma.hbm_to_vmem [thread:$0]  %s22_s26, 16384, %s24_s28, [#allocation3], %s2567_s9, %s2567_s9, %s2568_s10  }
   0x6   :  { %s2569_s11 = smov [#allocation5]  }
   0x7   :  { %s38_s12 = sshll.u32 %s2569_s11, 4  ;;  %s39_s12 = int_to_ptr.vmem [resolvable:$true] %s38_s12 }
   0x8   :  { %44 = dma.hbm_to_vmem [thread:$0]  %s37_s8, 4096, %s39_s12, [#allocation6], %s2567_s9, %s2567_s9, %s2568_s10  }
   0x9   :  { %2560 = dma.done.wait [#allocation3], 16384  }
   0xa   :  { %2561 = vsyncadd [#allocation3], 4294950912 }
   0xb   :  { %2562 = dma.done.wait [#allocation6], 4096  }
   0xc   :  { %2563 = vsyncadd [#allocation6], 4294963200  ;;  %v1658_v0 = vld [vmem:[#allocation2 + $0x70] sm:$0xf]  ;;  %v2319_v1 = vld [vmem:[#allocation2 + $0x74] sm:$0xf0] }
   0xd   :  { %v1722_v2 = vld [vmem:[#allocation2 + $0xf0] sm:$0xf]  ;;  %v1659_v3 = vor.u32 %v2319_v1, %v1658_v0  ;;  %v2335_v4 = vld [vmem:[#allocation2 + $0xf4] sm:$0xf0]  ;;  %v1650_v11 = vld [vmem:[#allocation2 + $0x60] sm:$0xf] }
   0xe   :  { %v1786_v5 = vld [vmem:[#allocation2 + $0x170] sm:$0xf]  ;;  %v2351_v6 = vld [vmem:[#allocation2 + $0x174] sm:$0xf0]  ;;  %v1723_v7 = vor.u32 %v2335_v4, %v1722_v2  ;;  %v2317_v13 = vld [vmem:[#allocation2 + $0x64] sm:$0xf0] }
   0xf   :  { %v1787_v8 = vor.u32 %v2351_v6, %v1786_v5  ;;  %v1850_v9 = vld [vmem:[#allocation2 + $0x1f0] sm:$0xf]  ;;  %v2367_v10 = vld [vmem:[#allocation2 + $0x1f4] sm:$0xf0]  ;;  %928 = vmatpush.bf16.msra.mxu0 %v1659_v3  ;;  %v1714_v14 = vld [vmem:[#allocation2 + $0xe0] sm:$0xf]  ;;  %v1651_v16 = vor.u32 %v2317_v13, %v1650_v11 }
  0x10   :  { %v1851_v12 = vor.u32 %v2367_v10, %v1850_v9  ;;  %v2333_v15 = vld [vmem:[#allocation2 + $0xe4] sm:$0xf0]  ;;  %942 = vmatpush.bf16.msra.mxu1 %v1723_v7  ;;  %v1778_v18 = vld [vmem:[#allocation2 + $0x160] sm:$0xf]  ;;  %v1642_v23 = vld [vmem:[#allocation2 + $0x50] sm:$0xf] }
  0x11   :  { %956 = vmatpush.bf16.msra.mxu2 %v1787_v8  ;;  %v1715_v17 = vor.u32 %v2333_v15, %v1714_v14  ;;  %v2349_v19 = vld [vmem:[#allocation2 + $0x164] sm:$0xf0]  ;;  %v1842_v20 = vld [vmem:[#allocation2 + $0x1e0] sm:$0xf]  ;;  %v2315_v24 = vld [vmem:[#allocation2 + $0x54] sm:$0xf0] }
  0x12   :  { %970 = vmatpush.bf16.msra.mxu3 %v1851_v12  ;;  %v1779_v21 = vor.u32 %v2349_v19, %v1778_v18  ;;  %v2365_v22 = vld [vmem:[#allocation2 + $0x1e4] sm:$0xf0]  ;;  %v1706_v26 = vld [vmem:[#allocation2 + $0xd0] sm:$0xf]  ;;  %v2331_v27 = vld [vmem:[#allocation2 + $0xd4] sm:$0xf0]  ;;  %v1643_v29 = vor.u32 %v2315_v24, %v1642_v23 }
  0x13   :  { %v1843_v25 = vor.u32 %v2365_v22, %v1842_v20  ;;  %v1770_v28 = vld [vmem:[#allocation2 + $0x150] sm:$0xf]  ;;  %929 = vmatpush.bf16.msra.mxu0 %v1651_v16  ;;  %v2347_v30 = vld [vmem:[#allocation2 + $0x154] sm:$0xf0]  ;;  %v1707_v33 = vor.u32 %v2331_v27, %v1706_v26  ;;  %v1634_v35 = vld [vmem:[#allocation2 + $0x40] sm:$0xf] }
  0x14   :  { %v1834_v31 = vld [vmem:[#allocation2 + $0x1d0] sm:$0xf]  ;;  %v2363_v32 = vld [vmem:[#allocation2 + $0x1d4] sm:$0xf0]  ;;  %943 = vmatpush.bf16.msra.mxu1 %v1715_v17  ;;  %v1771_v34 = vor.u32 %v2347_v30, %v1770_v28  ;;  %v2313_v36 = vld [vmem:[#allocation2 + $0x44] sm:$0xf0] }
  0x15   :  { %957 = vmatpush.bf16.msra.mxu2 %v1779_v21  ;;  %v1698_v37 = vld [vmem:[#allocation2 + $0xc0] sm:$0xf]  ;;  %v1835_v38 = vor.u32 %v2363_v32, %v1834_v31  ;;  %v2329_v39 = vld [vmem:[#allocation2 + $0xc4] sm:$0xf0]  ;;  %v1635_v44 = vor.u32 %v2313_v36, %v1634_v35  ;;  %v1626_v47 = vld [vmem:[#allocation2 + $0x30] sm:$0xf] }
  0x16   :  { %971 = vmatpush.bf16.msra.mxu3 %v1843_v25  ;;  %v1762_v40 = vld [vmem:[#allocation2 + $0x140] sm:$0xf]  ;;  %v2345_v41 = vld [vmem:[#allocation2 + $0x144] sm:$0xf0]  ;;  %v1699_v45 = vor.u32 %v2329_v39, %v1698_v37  ;;  %v2311_v48 = vld [vmem:[#allocation2 + $0x34] sm:$0xf0] }
  0x17   :  { %v1826_v42 = vld [vmem:[#allocation2 + $0x1c0] sm:$0xf]  ;;  %v2361_v43 = vld [vmem:[#allocation2 + $0x1c4] sm:$0xf0]  ;;  %930 = vmatpush.bf16.msra.mxu0 %v1643_v29  ;;  %v1763_v46 = vor.u32 %v2345_v41, %v1762_v40  ;;  %v1690_v49 = vld [vmem:[#allocation2 + $0xb0] sm:$0xf]  ;;  %v1627_v56 = vor.u32 %v2311_v48, %v1626_v47 }
  0x18   :  { %944 = vmatpush.bf16.msra.mxu1 %v1707_v33  ;;  %v1827_v50 = vor.u32 %v2361_v43, %v1826_v42  ;;  %v2327_v51 = vld [vmem:[#allocation2 + $0xb4] sm:$0xf0]  ;;  %v1754_v52 = vld [vmem:[#allocation2 + $0x130] sm:$0xf]  ;;  %v1618_v59 = vld [vmem:[#allocation2 + $0x20] sm:$0xf] }
  0x19   :  { %958 = vmatpush.bf16.msra.mxu2 %v1771_v34  ;;  %v2343_v53 = vld [vmem:[#allocation2 + $0x134] sm:$0xf0]  ;;  %v1818_v54 = vld [vmem:[#allocation2 + $0x1b0] sm:$0xf]  ;;  %v1691_v57 = vor.u32 %v2327_v51, %v1690_v49  ;;  %v2309_v60 = vld [vmem:[#allocation2 + $0x24] sm:$0xf0] }
  0x1a   :  { %972 = vmatpush.bf16.msra.mxu3 %v1835_v38  ;;  %v2359_v55 = vld [vmem:[#allocation2 + $0x1b4] sm:$0xf0]  ;;  %v1755_v58 = vor.u32 %v2343_v53, %v1754_v52  ;;  %v1682_v61 = vld [vmem:[#allocation2 + $0xa0] sm:$0xf]  ;;  %v2325_v63 = vld [vmem:[#allocation2 + $0xa4] sm:$0xf0]  ;;  %v1619_v4 = vor.u32 %v2309_v60, %v1618_v59 }
  0x1b   :  { %931 = vmatpush.bf16.msra.mxu0 %v1635_v44  ;;  %v1819_v62 = vor.u32 %v2359_v55, %v1818_v54  ;;  %v1746_v0 = vld [vmem:[#allocation2 + $0x120] sm:$0xf]  ;;  %v2341_v1 = vld [vmem:[#allocation2 + $0x124] sm:$0xf0]  ;;  %v1683_v5 = vor.u32 %v2325_v63, %v1682_v61  ;;  %v1610_v7 = vld [vmem:[#allocation2 + $0x10] sm:$0xf] }
  0x1c   :  { %945 = vmatpush.bf16.msra.mxu1 %v1699_v45  ;;  %v1810_v2 = vld [vmem:[#allocation2 + $0x1a0] sm:$0xf]  ;;  %v2357_v3 = vld [vmem:[#allocation2 + $0x1a4] sm:$0xf0]  ;;  %v1747_v6 = vor.u32 %v2341_v1, %v1746_v0  ;;  %v2307_v8 = vld [vmem:[#allocation2 + $0x14] sm:$0xf0] }
  0x1d   :  { %959 = vmatpush.bf16.msra.mxu2 %v1763_v46  ;;  %v1674_v9 = vld [vmem:[#allocation2 + $0x90] sm:$0xf]  ;;  %v1811_v10 = vor.u32 %v2357_v3, %v1810_v2  ;;  %v2323_v11 = vld [vmem:[#allocation2 + $0x94] sm:$0xf0]  ;;  %v1611_v16 = vor.u32 %v2307_v8, %v1610_v7  ;;  %v1602_v17 = vld [vmem:[#allocation2] sm:$0xf] }
  0x1e   :  { %973 = vmatpush.bf16.msra.mxu3 %v1827_v50  ;;  %v1738_v12 = vld [vmem:[#allocation2 + $0x110] sm:$0xf]  ;;  %v2339_v13 = vld [vmem:[#allocation2 + $0x114] sm:$0xf0]  ;;  %v2305_v18 = vld [vmem:[#allocation2 + $0x4] sm:$0xf0]  ;;  %v1675_v19 = vor.u32 %v2323_v11, %v1674_v9 }
  0x1f   :  { %932 = vmatpush.bf16.msra.mxu0 %v1627_v56  ;;  %v1802_v14 = vld [vmem:[#allocation2 + $0x190] sm:$0xf]  ;;  %v2355_v15 = vld [vmem:[#allocation2 + $0x194] sm:$0xf0]  ;;  %v1739_v20 = vor.u32 %v2339_v13, %v1738_v12  ;;  %v1666_v21 = vld [vmem:[#allocation2 + $0x80] sm:$0xf]  ;;  %v1603_v31 = vor.u32 %v2305_v18, %v1602_v17 }
  0x20   :  { %946 = vmatpush.bf16.msra.mxu1 %v1691_v57  ;;  %v2321_v22 = vld [vmem:[#allocation2 + $0x84] sm:$0xf0]  ;;  %v1730_v23 = vld [vmem:[#allocation2 + $0x100] sm:$0xf]  ;;  %v1803_v24 = vor.u32 %v2355_v15, %v1802_v14  ;;  %v1914_v28 = vld [vmem:[#allocation2 + $0x270] sm:$0xf] }
  0x21   :  { %960 = vmatpush.bf16.msra.mxu2 %v1755_v58  ;;  %v2337_v25 = vld [vmem:[#allocation2 + $0x104] sm:$0xf0]  ;;  %v1794_v26 = vld [vmem:[#allocation2 + $0x180] sm:$0xf]  ;;  %v2383_v29 = vld [vmem:[#allocation2 + $0x274] sm:$0xf0]  ;;  %v1667_v35 = vor.u32 %v2321_v22, %v1666_v21 }
  0x22   :  { %974 = vmatpush.bf16.msra.mxu3 %v1819_v62  ;;  %v2353_v27 = vld [vmem:[#allocation2 + $0x184] sm:$0xf0]  ;;  %v1978_v30 = vld [vmem:[#allocation2 + $0x2f0] sm:$0xf]  ;;  %v2399_v32 = vld [vmem:[#allocation2 + $0x2f4] sm:$0xf0]  ;;  %v1731_v36 = vor.u32 %v2337_v25, %v1730_v23  ;;  %v1915_v40 = vor.u32 %v2383_v29, %v1914_v28 }
  0x23   :  { %933 = vmatpush.bf16.msra.mxu0 %v1619_v4  ;;  %v2042_v33 = vld [vmem:[#allocation2 + $0x370] sm:$0xf]  ;;  %v2415_v34 = vld [vmem:[#allocation2 + $0x374] sm:$0xf0]  ;;  %v1795_v39 = vor.u32 %v2353_v27, %v1794_v26  ;;  %v1906_v41 = vld [vmem:[#allocation2 + $0x260] sm:$0xf]  ;;  %v1979_v43 = vor.u32 %v2399_v32, %v1978_v30 }
  0x24   :  { %947 = vmatpush.bf16.msra.mxu1 %v1683_v5  ;;  %v2106_v37 = vld [vmem:[#allocation2 + $0x3f0] sm:$0xf]  ;;  %v2431_v38 = vld [vmem:[#allocation2 + $0x3f4] sm:$0xf0]  ;;  %v2381_v42 = vld [vmem:[#allocation2 + $0x264] sm:$0xf0]  ;;  %v2043_v44 = vor.u32 %v2415_v34, %v2042_v33 }
  0x25   :  { %961 = vmatpush.bf16.msra.mxu2 %v1747_v6  ;;  %v1970_v45 = vld [vmem:[#allocation2 + $0x2e0] sm:$0xf]  ;;  %v2397_v46 = vld [vmem:[#allocation2 + $0x2e4] sm:$0xf0]  ;;  %v2107_v48 = vor.u32 %v2431_v38, %v2106_v37  ;;  %v1898_v52 = vld [vmem:[#allocation2 + $0x250] sm:$0xf]  ;;  %v1907_v56 = vor.u32 %v2381_v42, %v1906_v41 }
  0x26   :  { %975 = vmatpush.bf16.msra.mxu3 %v1811_v10  ;;  %v2034_v47 = vld [vmem:[#allocation2 + $0x360] sm:$0xf]  ;;  %v2413_v49 = vld [vmem:[#allocation2 + $0x364] sm:$0xf0]  ;;  %v59_v53 = vld [vmem:[%s2772_s0] sm:$0xff]  ;;  %v1971_v59 = vor.u32 %v2397_v46, %v1970_v45 }
  0x27   :  { %934 = vmatpush.bf16.msra.mxu0 %v1611_v16  ;;  %v2098_v50 = vld [vmem:[#allocation2 + $0x3e0] sm:$0xf]  ;;  %v2429_v51 = vld [vmem:[#allocation2 + $0x3e4] sm:$0xf0]  ;;  %v63_v55 = vld [vmem:[%s2772_s0 + $0x20] sm:$0xff]  ;;  %v2035_v60 = vor.u32 %v2413_v49, %v2034_v47 }
  0x28   :  { %948 = vmatpush.bf16.msra.mxu1 %v1675_v19  ;;  %v61_v54 = vld [vmem:[%s2772_s0 + $0x10] sm:$0xff]  ;;  %v2379_v57 = vld [vmem:[#allocation2 + $0x254] sm:$0xf0]  ;;  %91 = vst [vmem:[#allocation1] ss:$4 sm:$0xff] %v59_v53  ;;  %v2099_v63 = vor.u32 %v2429_v51, %v2098_v50 }
  0x29   :  { %962 = vmatpush.bf16.msra.mxu2 %v1739_v20  ;;  %v65_v58 = vld [vmem:[%s2772_s0 + $0x30] sm:$0xff]  ;;  %v1962_v61 = vld [vmem:[#allocation2 + $0x2d0] sm:$0xf]  ;;  %v2395_v62 = vld [vmem:[#allocation2 + $0x2d4] sm:$0xf0]  ;;  %v1899_v4 = vor.u32 %v2379_v57, %v1898_v52 }
  0x2a   :  { %976 = vmatpush.bf16.msra.mxu3 %v1803_v24  ;;  %93 = vst [vmem:[#allocation1 + $0x1] ss:$4 sm:$0xff] %v61_v54  ;;  %v2026_v0 = vld [vmem:[#allocation2 + $0x350] sm:$0xf]  ;;  %v2411_v1 = vld [vmem:[#allocation2 + $0x354] sm:$0xf0]  ;;  %v1963_v7 = vor.u32 %v2395_v62, %v1962_v61 }
  0x2b   :  { %935 = vmatpush.bf16.msra.mxu0 %v1603_v31  ;;  %95 = vst [vmem:[#allocation1 + $0x2] ss:$4 sm:$0xff] %v63_v55  ;;  %v2090_v2 = vld [vmem:[#allocation2 + $0x3d0] sm:$0xf]  ;;  %v2427_v3 = vld [vmem:[#allocation2 + $0x3d4] sm:$0xf0]  ;;  %v2027_v8 = vor.u32 %v2411_v1, %v2026_v0 }
  0x2c   :  { %949 = vmatpush.bf16.msra.mxu1 %v1667_v35  ;;  %97 = vst [vmem:[#allocation1 + $0x3] ss:$4 sm:$0xff] %v65_v58  ;;  %v1890_v5 = vld [vmem:[#allocation2 + $0x240] sm:$0xf]  ;;  %v2377_v6 = vld [vmem:[#allocation2 + $0x244] sm:$0xf0]  ;;  %v2091_v12 = vor.u32 %v2427_v3, %v2090_v2 }
  0x2d   :  { %963 = vmatpush.bf16.msra.mxu2 %v1731_v36  ;;  %v1954_v9 = vld [vmem:[#allocation2 + $0x2c0] sm:$0xf]  ;;  %v2393_v10 = vld [vmem:[#allocation2 + $0x2c4] sm:$0xf0]  ;;  %v67_v16 = vld [vmem:[%s2772_s0 + $0x40] sm:$0xff]  ;;  %v1891_v19 = vor.u32 %v2377_v6, %v1890_v5 }
  0x2e   :  { %977 = vmatpush.bf16.msra.mxu3 %v1795_v39  ;;  %v2018_v11 = vld [vmem:[#allocation2 + $0x340] sm:$0xf]  ;;  %v2409_v13 = vld [vmem:[#allocation2 + $0x344] sm:$0xf0]  ;;  %v1882_v17 = vld [vmem:[#allocation2 + $0x230] sm:$0xf]  ;;  %v1955_v24 = vor.u32 %v2393_v10, %v1954_v9 }
  0x2f   :  { %984 = vmatpush.bf16.msrb.mxu0 %v1915_v40  ;;  %v2082_v14 = vld [vmem:[#allocation2 + $0x3c0] sm:$0xf]  ;;  %v2425_v15 = vld [vmem:[#allocation2 + $0x3c4] sm:$0xf0]  ;;  %v2375_v18 = vld [vmem:[#allocation2 + $0x234] sm:$0xf0]  ;;  %v2019_v25 = vor.u32 %v2409_v13, %v2018_v11 }
  0x30   :  { %998 = vmatpush.bf16.msrb.mxu1 %v1979_v43  ;;  %v69_v20 = vld [vmem:[%s2772_s0 + $0x50] sm:$0xff]  ;;  %v1946_v21 = vld [vmem:[#allocation2 + $0x2b0] sm:$0xf]  ;;  %v2391_v22 = vld [vmem:[#allocation2 + $0x2b4] sm:$0xf0]  ;;  %v2083_v30 = vor.u32 %v2425_v15, %v2082_v14  ;;  %v1883_v36 = vor.u32 %v2375_v18, %v1882_v17 }
  0x31   :  { %1012 = vmatpush.bf16.msrb.mxu2 %v2043_v44  ;;  %v2010_v23 = vld [vmem:[#allocation2 + $0x330] sm:$0xf]  ;;  %v71_v26 = vld [vmem:[%s2772_s0 + $0x60] sm:$0xff]  ;;  %v73_v31 = vld [vmem:[%s2772_s0 + $0x70] sm:$0xff]  ;;  %v1947_v39 = vor.u32 %v2391_v22, %v1946_v21 }
  0x32   :  { %1026 = vmatpush.bf16.msrb.mxu3 %v2107_v48  ;;  %v2407_v27 = vld [vmem:[#allocation2 + $0x334] sm:$0xf0]  ;;  %v2074_v28 = vld [vmem:[#allocation2 + $0x3b0] sm:$0xf]  ;;  %v1874_v37 = vld [vmem:[#allocation2 + $0x220] sm:$0xf] }
  0x33   :  { %985 = vmatpush.bf16.msrb.mxu0 %v1907_v56  ;;  %v2423_v29 = vld [vmem:[#allocation2 + $0x3b4] sm:$0xf0]  ;;  %v2643_v33 = vld.sshfl [vmem:[#allocation1 + $0x8] sm:$0xff pattern:$0x73625140]  ;;  %v2011_v40 = vor.u32 %v2407_v27, %v2010_v23  ;;  %v62_v62 = vld [vmem:[%s2772_s0 + $0x18] sm:$0xff] }
  0x34   :  { %999 = vmatpush.bf16.msrb.mxu1 %v1971_v59  ;;  %v106_v32 = vld.sshfl [vmem:[#allocation1] sm:$0xff pattern:$0x73625140]  ;;  %v108_v34 = vld.sshfl [vmem:[#allocation1 + $0x10] sm:$0xff pattern:$0x73625140]  ;;  %v2075_v43 = vor.u32 %v2423_v29, %v2074_v28 }
  0x35   :  { %1013 = vmatpush.bf16.msrb.mxu2 %v2035_v60  ;;  %v2645_v35 = vld.sshfl [vmem:[#allocation1 + $0x18] sm:$0xff pattern:$0x73625140]  ;;  %v2373_v38 = vld [vmem:[#allocation2 + $0x224] sm:$0xf0]  ;;  %v60_v61 = vld [vmem:[%s2772_s0 + $0x8] sm:$0xff] }
  0x36   :  { %1027 = vmatpush.bf16.msrb.mxu3 %v2099_v63  ;;  %114 = vst [vmem:[#allocation1] ss:$4 sm:$0xff] %v67_v16  ;;  %v1938_v41 = vld [vmem:[#allocation2 + $0x2a0] sm:$0xf]  ;;  %v2389_v42 = vld [vmem:[#allocation2 + $0x2a4] sm:$0xf0]  ;;  %v1875_v48 = vor.u32 %v2373_v38, %v1874_v37 }
  0x37   :  { %986 = vmatpush.bf16.msrb.mxu0 %v1899_v4  ;;  %115 = vst [vmem:[#allocation1 + $0x1] ss:$4 sm:$0xff] %v69_v20  ;;  %v2002_v44 = vld [vmem:[#allocation2 + $0x320] sm:$0xf]  ;;  %v2405_v45 = vld [vmem:[#allocation2 + $0x324] sm:$0xf0]  ;;  %v1939_v50 = vor.u32 %v2389_v42, %v1938_v41 }
  0x38   :  { %1000 = vmatpush.bf16.msrb.mxu1 %v1963_v7  ;;  %116 = vst [vmem:[#allocation1 + $0x2] ss:$4 sm:$0xff] %v71_v26  ;;  %v2066_v46 = vld [vmem:[#allocation2 + $0x3a0] sm:$0xf]  ;;  %v2421_v47 = vld [vmem:[#allocation2 + $0x3a4] sm:$0xf0]  ;;  %v2003_v51 = vor.u32 %v2405_v45, %v2002_v44 }
  0x39   :  { %1014 = vmatpush.bf16.msrb.mxu2 %v2027_v8  ;;  %117 = vst [vmem:[#allocation1 + $0x3] ss:$4 sm:$0xff] %v73_v31  ;;  %v1866_v49 = vld [vmem:[#allocation2 + $0x210] sm:$0xf]  ;;  %v2371_v52 = vld [vmem:[#allocation2 + $0x214] sm:$0xf0]  ;;  %v2067_v55 = vor.u32 %v2421_v47, %v2066_v46 }
  0x3a   :  { %1028 = vmatpush.bf16.msrb.mxu3 %v2091_v12  ;;  %v1930_v53 = vld [vmem:[#allocation2 + $0x290] sm:$0xf]  ;;  %v2387_v54 = vld [vmem:[#allocation2 + $0x294] sm:$0xf0]  ;;  %v1858_v60 = vld [vmem:[#allocation2 + $0x200] sm:$0xf]  ;;  %v1867_v63 = vor.u32 %v2371_v52, %v1866_v49 }
  0x3b   :  { %987 = vmatpush.bf16.msrb.mxu0 %v1891_v19  ;;  %v1994_v56 = vld [vmem:[#allocation2 + $0x310] sm:$0xf]  ;;  %v2403_v57 = vld [vmem:[#allocation2 + $0x314] sm:$0xf0]  ;;  %v2369_v0 = vld [vmem:[#allocation2 + $0x204] sm:$0xf0]  ;;  %v1931_v7 = vor.u32 %v2387_v54, %v1930_v53 }
  0x3c   :  { %1001 = vmatpush.bf16.msrb.mxu1 %v1955_v24  ;;  %v2058_v58 = vld [vmem:[#allocation2 + $0x390] sm:$0xf]  ;;  %v2419_v59 = vld [vmem:[#allocation2 + $0x394] sm:$0xf0]  ;;  %v2318_v1 = vld [vmem:[#allocation2 + $0x74] sm:$0xf]  ;;  %v1995_v16 = vor.u32 %v2403_v57, %v1994_v56  ;;  %v1859_v21 = vor.u32 %v2369_v0, %v1858_v60 }
  0x3d   :  { %1015 = vmatpush.bf16.msrb.mxu2 %v2019_v25  ;;  %99 = vst [vmem:[#allocation1 + $0x20] ss:$4 sm:$0xff] %v60_v61  ;;  %v1660_v2 = vld [vmem:[#allocation2 + $0x78] sm:$0xf0]  ;;  %v64_v3 = vld [vmem:[%s2772_s0 + $0x28] sm:$0xff]  ;;  %v66_v4 = vld [vmem:[%s2772_s0 + $0x38] sm:$0xff]  ;;  %v2059_v17 = vor.u32 %v2419_v59, %v2058_v58 }
  0x3e   :  { %1029 = vmatpush.bf16.msrb.mxu3 %v2083_v30  ;;  %101 = vst [vmem:[#allocation1 + $0x21] ss:$4 sm:$0xff] %v62_v62  ;;  %v1922_v8 = vld [vmem:[#allocation2 + $0x280] sm:$0xf]  ;;  %v2385_v9 = vld [vmem:[#allocation2 + $0x284] sm:$0xf0]  ;;  %v1663_v24 = vor.u32 %v2318_v1, %v1660_v2 }
  0x3f   :  { %988 = vmatpush.bf16.msrb.mxu0 %v1883_v36  ;;  %v1986_v10 = vld [vmem:[#allocation2 + $0x300] sm:$0xf]  ;;  %v2401_v11 = vld [vmem:[#allocation2 + $0x304] sm:$0xf0]  ;;  %v2334_v23 = vld [vmem:[#allocation2 + $0xf4] sm:$0xf]  ;;  %v1923_v30 = vor.u32 %v2385_v9, %v1922_v8 }
  0x40   :  { %1002 = vmatpush.bf16.msrb.mxu1 %v1947_v39  ;;  %v122_v5 = vld.sshfl [vmem:[#allocation1] sm:$0xff pattern:$0x73625140]  ;;  %v124_v6 = vld.sshfl [vmem:[#allocation1 + $0x10] sm:$0xff pattern:$0x73625140]  ;;  %v1987_v31 = vor.u32 %v2401_v11, %v1986_v10 }
  0x41   :  { %1016 = vmatpush.bf16.msrb.mxu2 %v2011_v40  ;;  %v2659_v12 = vpack.c.bf16 %v122_v5, %v106_v32  ;;  %v2661_v13 = vpack.c.bf16 %v124_v6, %v108_v34  ;;  %v123_v14 = vld.sshfl [vmem:[#allocation1 + $0x8] sm:$0xff pattern:$0x73625140]  ;;  %v125_v15 = vld.sshfl [vmem:[#allocation1 + $0x18] sm:$0xff pattern:$0x73625140] }
  0x42   :  { %1030 = vmatpush.bf16.msrb.mxu3 %v2075_v43  ;;  %v2050_v18 = vld [vmem:[#allocation2 + $0x380] sm:$0xf]  ;;  %v2664_v19 = vpack.c.bf16 %v123_v14, %v2643_v33  ;;  %v2667_v20 = vpack.c.bf16 %v125_v15, %v2645_v35  ;;  %v2417_v22 = vld [vmem:[#allocation2 + $0x384] sm:$0xf0]  ;;  %103 = vst [vmem:[#allocation1 + $0x22] ss:$4 sm:$0xff] %v64_v3 }
  0x43   :  { %989 = vmatpush.bf16.msrb.mxu0 %v1875_v48  ;;  %964 = vmatmul.bf16.vlgmr.msra.gmra.mxu2 %v2661_v13  ;;  %v1724_v25 = vld [vmem:[#allocation2 + $0xf8] sm:$0xf0]  ;;  %v2350_v26 = vld [vmem:[#allocation2 + $0x174] sm:$0xf]  ;;  %105 = vst [vmem:[#allocation1 + $0x23] ss:$4 sm:$0xff] %v66_v4  ;;  %v2051_v34 = vor.u32 %v2417_v22, %v2050_v18 }
  0x44   :  { %1003 = vmatpush.bf16.msrb.mxu1 %v1939_v50  ;;  %936 = vmatmul.bf16.vlgmr.msra.gmra.mxu0 %v2659_v12  ;;  %v1788_v27 = vld [vmem:[#allocation2 + $0x178] sm:$0xf0]  ;;  %v2366_v28 = vld [vmem:[#allocation2 + $0x1f4] sm:$0xf]  ;;  %v2316_v32 = vld [vmem:[#allocation2 + $0x64] sm:$0xf]  ;;  %v1727_v35 = vor.u32 %v2334_v23, %v1724_v25 }
  0x45   :  { %1017 = vmatpush.bf16.msrb.mxu2 %v2003_v51  ;;  %950 = vmatmul.bf16.vlgmr.msra.gmra.mxu1 %v2664_v19  ;;  %v1852_v29 = vld [vmem:[#allocation2 + $0x1f8] sm:$0xf0]  ;;  %v1652_v33 = vld [vmem:[#allocation2 + $0x68] sm:$0xf0]  ;;  %v2332_v36 = vld [vmem:[#allocation2 + $0xe4] sm:$0xf]  ;;  %v1791_v37 = vor.u32 %v2350_v26, %v1788_v27 }
  0x46   :  { %1031 = vmatpush.bf16.msrb.mxu3 %v2067_v55  ;;  %v1855_v38 = vor.u32 %v2366_v28, %v1852_v29  ;;  %v68_v39 = vld [vmem:[%s2772_s0 + $0x48] sm:$0xff]  ;;  %v1716_v40 = vld [vmem:[#allocation2 + $0xe8] sm:$0xf0]  ;;  %v70_v43 = vld [vmem:[%s2772_s0 + $0x58] sm:$0xff]  ;;  %v1655_v44 = vor.u32 %v2316_v32, %v1652_v33 }
  0x47   :  { %990 = vmatpush.bf16.msrb.mxu0 %v1867_v63  ;;  %978 = vmatmul.bf16.vlgmr.msra.gmra.mxu3 %v2667_v20  ;;  %v2348_v41 = vld [vmem:[#allocation2 + $0x164] sm:$0xf]  ;;  %v1780_v42 = vld [vmem:[#allocation2 + $0x168] sm:$0xf0]  ;;  %v2314_v47 = vld [vmem:[#allocation2 + $0x54] sm:$0xf]  ;;  %v1719_v55 = vor.u32 %v2332_v36, %v1716_v40 }
  0x48   :  { %1004 = vmatpush.bf16.msrb.mxu1 %v1931_v7  ;;  %v2364_v45 = vld [vmem:[#allocation2 + $0x1e4] sm:$0xf]  ;;  %v1844_v46 = vld [vmem:[#allocation2 + $0x1e8] sm:$0xf0]  ;;  %v1644_v49 = vld [vmem:[#allocation2 + $0x58] sm:$0xf0]  ;;  %v1783_v60 = vor.u32 %v2348_v41, %v1780_v42 }
  0x49   :  { %1018 = vmatpush.bf16.msrb.mxu2 %v1995_v16  ;;  %v72_v48 = vld [vmem:[%s2772_s0 + $0x68] sm:$0xff]  ;;  %v2330_v50 = vld [vmem:[#allocation2 + $0xd4] sm:$0xf]  ;;  %v1708_v51 = vld [vmem:[#allocation2 + $0xd8] sm:$0xf0]  ;;  %v1847_v61 = vor.u32 %v2364_v45, %v1844_v46  ;;  %v1647_v62 = vor.u32 %v2314_v47, %v1644_v49 }
  0x4a   :  { %1032 = vmatpush.bf16.msrb.mxu3 %v2059_v17  ;;  %v74_v52 = vld [vmem:[%s2772_s0 + $0x78] sm:$0xff]  ;;  %v110_v53 = vld.sshfl [vmem:[#allocation1 + $0x20] sm:$0xff pattern:$0x73625140]  ;;  %v2312_v1 = vld [vmem:[#allocation2 + $0x44] sm:$0xf]  ;;  %v1711_v3 = vor.u32 %v2330_v50, %v1708_v51 }
  0x4b   :  { %991 = vmatpush.bf16.msrb.mxu0 %v1859_v21  ;;  %v2685_v54 = vld.sshfl [vmem:[#allocation1 + $0x28] sm:$0xff pattern:$0x73625140]  ;;  %v2346_v56 = vld [vmem:[#allocation2 + $0x154] sm:$0xf] }
  0x4c   :  { %1005 = vmatpush.bf16.msrb.mxu1 %v1923_v30  ;;  %v1772_v57 = vld [vmem:[#allocation2 + $0x158] sm:$0xf0]  ;;  %v112_v58 = vld.sshfl [vmem:[#allocation1 + $0x30] sm:$0xff pattern:$0x73625140] }
  0x4d   :  { %1019 = vmatpush.bf16.msrb.mxu2 %v1987_v31  ;;  %v113_v59 = vld.sshfl [vmem:[#allocation1 + $0x38] sm:$0xff pattern:$0x73625140]  ;;  %v1836_v0 = vld [vmem:[#allocation2 + $0x1d8] sm:$0xf0]  ;;  %v1775_v5 = vor.u32 %v2346_v56, %v1772_v57 }
  0x4e   :  { %1033 = vmatpush.bf16.msrb.mxu3 %v2051_v34  ;;  %118 = vst [vmem:[#allocation1 + $0x20] ss:$4 sm:$0xff] %v68_v39  ;;  %v2362_v63 = vld [vmem:[#allocation2 + $0x1d4] sm:$0xf]  ;;  %v1636_v2 = vld [vmem:[#allocation2 + $0x48] sm:$0xf0] }
  0x4f   :  { %1040 = vmatpush.bf16.msra.mxu0 %v1663_v24  ;;  %119 = vst [vmem:[#allocation1 + $0x21] ss:$4 sm:$0xff] %v70_v43  ;;  %v2328_v4 = vld [vmem:[#allocation2 + $0xc4] sm:$0xf]  ;;  %v1839_v6 = vor.u32 %v2362_v63, %v1836_v0  ;;  %v1700_v7 = vld [vmem:[#allocation2 + $0xc8] sm:$0xf0]  ;;  %v1639_v9 = vor.u32 %v2312_v1, %v1636_v2 }
  0x50   :  { %1054 = vmatpush.bf16.msra.mxu1 %v1727_v35  ;;  %120 = vst [vmem:[#allocation1 + $0x22] ss:$4 sm:$0xff] %v72_v48  ;;  %v2344_v8 = vld [vmem:[#allocation2 + $0x144] sm:$0xf]  ;;  %v1764_v10 = vld [vmem:[#allocation2 + $0x148] sm:$0xf0]  ;;  %v1703_v17 = vor.u32 %v2328_v4, %v1700_v7 }
  0x51   :  { %1068 = vmatpush.bf16.msra.mxu2 %v1791_v37  ;;  %121 = vst [vmem:[#allocation1 + $0x23] ss:$4 sm:$0xff] %v74_v52  ;;  %v2360_v11 = vld [vmem:[#allocation2 + $0x1c4] sm:$0xf]  ;;  %v1828_v14 = vld [vmem:[#allocation2 + $0x1c8] sm:$0xf0]  ;;  %v1767_v18 = vor.u32 %v2344_v8, %v1764_v10 }
  0x52   :  { %1082 = vmatpush.bf16.msra.mxu3 %v1855_v38  ;;  %v2310_v15 = vld [vmem:[#allocation2 + $0x34] sm:$0xf]  ;;  %v1628_v16 = vld [vmem:[#allocation2 + $0x38] sm:$0xf0]  ;;  %v1831_v21 = vor.u32 %v2360_v11, %v1828_v14  ;;  %v2308_v29 = vld [vmem:[#allocation2 + $0x24] sm:$0xf] }
  0x53   :  { %1041 = vmatpush.bf16.msra.mxu0 %v1655_v44  ;;  %v2326_v22 = vld [vmem:[#allocation2 + $0xb4] sm:$0xf]  ;;  %v1692_v23 = vld [vmem:[#allocation2 + $0xb8] sm:$0xf0]  ;;  %v1631_v24 = vor.u32 %v2310_v15, %v1628_v16  ;;  %v1620_v30 = vld [vmem:[#allocation2 + $0x28] sm:$0xf0] }
  0x54   :  { %1055 = vmatpush.bf16.msra.mxu1 %v1719_v55  ;;  %v2342_v25 = vld [vmem:[#allocation2 + $0x134] sm:$0xf]  ;;  %v1756_v26 = vld [vmem:[#allocation2 + $0x138] sm:$0xf0]  ;;  %v1695_v33 = vor.u32 %v2326_v22, %v1692_v23  ;;  %v2324_v34 = vld [vmem:[#allocation2 + $0xa4] sm:$0xf]  ;;  %v1623_v44 = vor.u32 %v2308_v29, %v1620_v30 }
  0x55   :  { %1069 = vmatpush.bf16.msra.mxu2 %v1783_v60  ;;  %v2358_v27 = vld [vmem:[#allocation2 + $0x1b4] sm:$0xf]  ;;  %v1820_v28 = vld [vmem:[#allocation2 + $0x1b8] sm:$0xf0]  ;;  %v1684_v35 = vld [vmem:[#allocation2 + $0xa8] sm:$0xf0]  ;;  %v1759_v40 = vor.u32 %v2342_v25, %v1756_v26 }
  0x56   :  { %1083 = vmatpush.bf16.msra.mxu3 %v1847_v61  ;;  %v1823_v43 = vor.u32 %v2358_v27, %v1820_v28  ;;  %v2340_v45 = vld [vmem:[#allocation2 + $0x124] sm:$0xf]  ;;  %v1748_v46 = vld [vmem:[#allocation2 + $0x128] sm:$0xf0]  ;;  %v2306_v49 = vld [vmem:[#allocation2 + $0x14] sm:$0xf]  ;;  %v1687_v51 = vor.u32 %v2324_v34, %v1684_v35 }
  0x57   :  { %1042 = vmatpush.bf16.msra.mxu0 %v1647_v62  ;;  %v2356_v47 = vld [vmem:[#allocation2 + $0x1a4] sm:$0xf]  ;;  %v1812_v48 = vld [vmem:[#allocation2 + $0x1a8] sm:$0xf0]  ;;  %v1612_v50 = vld [vmem:[#allocation2 + $0x18] sm:$0xf0]  ;;  %v1751_v52 = vor.u32 %v2340_v45, %v1748_v46 }
  0x58   :  { %1056 = vmatpush.bf16.msra.mxu1 %v1711_v3  ;;  %v126_v31 = vld.sshfl [vmem:[#allocation1 + $0x20] sm:$0xff pattern:$0x73625140]  ;;  %v128_v32 = vld.sshfl [vmem:[#allocation1 + $0x30] sm:$0xff pattern:$0x73625140]  ;;  %v1815_v55 = vor.u32 %v2356_v47, %v1812_v48  ;;  %v1615_v56 = vor.u32 %v2306_v49, %v1612_v50 }
  0x59   :  { %1070 = vmatpush.bf16.msra.mxu2 %v1775_v5  ;;  %v2687_v36 = vpack.c.bf16 %v126_v31, %v110_v53  ;;  %v2689_v37 = vpack.c.bf16 %v128_v32, %v112_v58  ;;  %v127_v38 = vld.sshfl [vmem:[#allocation1 + $0x28] sm:$0xff pattern:$0x73625140]  ;;  %v129_v39 = vld.sshfl [vmem:[#allocation1 + $0x38] sm:$0xff pattern:$0x73625140] }
  0x5a   :  { %1084 = vmatpush.bf16.msra.mxu3 %v1839_v6  ;;  %v2692_v41 = vpack.c.bf16 %v127_v38, %v2685_v54  ;;  %v2694_v42 = vpack.c.bf16 %v129_v39, %v113_v59  ;;  %v2322_v53 = vld [vmem:[#allocation2 + $0x94] sm:$0xf]  ;;  %v1676_v54 = vld [vmem:[#allocation2 + $0x98] sm:$0xf0]  ;;  %v2304_v61 = vld [vmem:[#allocation2 + $0x4] sm:$0xf] }
  0x5b   :  { %1043 = vmatpush.bf16.msra.mxu0 %v1639_v9  ;;  %1020 = vmatmul.bf16.vlgmr.msrb.gmra.mxu2 %v2689_v37  ;;  %v2338_v57 = vld [vmem:[#allocation2 + $0x114] sm:$0xf]  ;;  %v1740_v58 = vld [vmem:[#allocation2 + $0x118] sm:$0xf0]  ;;  %v1604_v62 = vld [vmem:[#allocation2 + $0x8] sm:$0xf0]  ;;  %v1679_v1 = vor.u32 %v2322_v53, %v1676_v54 }
  0x5c   :  { %1057 = vmatpush.bf16.msra.mxu1 %v1703_v17  ;;  %992 = vmatmul.bf16.vlgmr.msrb.gmra.mxu0 %v2687_v36  ;;  %v2354_v59 = vld [vmem:[#allocation2 + $0x194] sm:$0xf]  ;;  %v1804_v60 = vld [vmem:[#allocation2 + $0x198] sm:$0xf0]  ;;  %v1743_v2 = vor.u32 %v2338_v57, %v1740_v58  ;;  %v2320_v3 = vld [vmem:[#allocation2 + $0x84] sm:$0xf]  ;;  %v1607_v7 = vor.u32 %v2304_v61, %v1604_v62 }
  0x5d   :  { %1071 = vmatpush.bf16.msra.mxu2 %v1767_v18  ;;  %1006 = vmatmul.bf16.vlgmr.msrb.gmra.mxu1 %v2692_v41  ;;  %v2382_v63 = vld [vmem:[#allocation2 + $0x274] sm:$0xf]  ;;  %v1916_v0 = vld [vmem:[#allocation2 + $0x278] sm:$0xf0]  ;;  %v1668_v4 = vld [vmem:[#allocation2 + $0x88] sm:$0xf0]  ;;  %v1807_v6 = vor.u32 %v2354_v59, %v1804_v60 }
  0x5e   :  { %1085 = vmatpush.bf16.msra.mxu3 %v1831_v21  ;;  %v2336_v5 = vld [vmem:[#allocation2 + $0x104] sm:$0xf]  ;;  %v1732_v8 = vld [vmem:[#allocation2 + $0x108] sm:$0xf0]  ;;  %v1919_v11 = vor.u32 %v2382_v63, %v1916_v0  ;;  %v2398_v14 = vld [vmem:[#allocation2 + $0x2f4] sm:$0xf]  ;;  %v1671_v22 = vor.u32 %v2320_v3, %v1668_v4 }
  0x5f   :  { %1044 = vmatpush.bf16.msra.mxu0 %v1631_v24  ;;  %1034 = vmatmul.bf16.vlgmr.msrb.gmra.mxu3 %v2694_v42  ;;  %v2352_v9 = vld [vmem:[#allocation2 + $0x184] sm:$0xf]  ;;  %v1796_v10 = vld [vmem:[#allocation2 + $0x188] sm:$0xf0]  ;;  %v1980_v15 = vld [vmem:[#allocation2 + $0x2f8] sm:$0xf0]  ;;  %v1735_v23 = vor.u32 %v2336_v5, %v1732_v8 }
  0x60   :  { %1058 = vmatpush.bf16.msra.mxu1 %v1695_v33  ;;  %v2414_v16 = vld [vmem:[#allocation2 + $0x374] sm:$0xf]  ;;  %v2044_v17 = vld [vmem:[#allocation2 + $0x378] sm:$0xf0]  ;;  %v2380_v24 = vld [vmem:[#allocation2 + $0x264] sm:$0xf]  ;;  %v1799_v26 = vor.u32 %v2352_v9, %v1796_v10  ;;  %v1983_v27 = vor.u32 %v2398_v14, %v1980_v15 }
  0x61   :  { %1072 = vmatpush.bf16.msra.mxu2 %v1759_v40  ;;  %v2430_v18 = vld [vmem:[#allocation2 + $0x3f4] sm:$0xf]  ;;  %v2108_v21 = vld [vmem:[#allocation2 + $0x3f8] sm:$0xf0]  ;;  %v1908_v25 = vld [vmem:[#allocation2 + $0x268] sm:$0xf0]  ;;  %v2047_v28 = vor.u32 %v2414_v16, %v2044_v17 }
  0x62   :  { %1086 = vmatpush.bf16.msra.mxu3 %v1823_v43  ;;  %v2111_v29 = vor.u32 %v2430_v18, %v2108_v21  ;;  %v2396_v30 = vld [vmem:[#allocation2 + $0x2e4] sm:$0xf]  ;;  %v1972_v31 = vld [vmem:[#allocation2 + $0x2e8] sm:$0xf0]  ;;  %v1911_v33 = vor.u32 %v2380_v24, %v1908_v25  ;;  %v2378_v39 = vld [vmem:[#allocation2 + $0x254] sm:$0xf] }
  0x63   :  { %1045 = vmatpush.bf16.msra.mxu0 %v1623_v44  ;;  %v2412_v32 = vld [vmem:[#allocation2 + $0x364] sm:$0xf]  ;;  %v2036_v34 = vld [vmem:[#allocation2 + $0x368] sm:$0xf0]  ;;  %v1900_v40 = vld [vmem:[#allocation2 + $0x258] sm:$0xf0]  ;;  %v1975_v43 = vor.u32 %v2396_v30, %v1972_v31 }
  0x64   :  { %1059 = vmatpush.bf16.msra.mxu1 %v1687_v51  ;;  %v2428_v35 = vld [vmem:[#allocation2 + $0x3e4] sm:$0xf]  ;;  %v2100_v38 = vld [vmem:[#allocation2 + $0x3e8] sm:$0xf0]  ;;  %v2039_v44 = vor.u32 %v2412_v32, %v2036_v34  ;;  %v2394_v46 = vld [vmem:[#allocation2 + $0x2d4] sm:$0xf]  ;;  %v1903_v49 = vor.u32 %v2378_v39, %v1900_v40 }
  0x65   :  { %1073 = vmatpush.bf16.msra.mxu2 %v1751_v52  ;;  %v2103_v45 = vor.u32 %v2428_v35, %v2100_v38  ;;  %v1964_v47 = vld [vmem:[#allocation2 + $0x2d8] sm:$0xf0]  ;;  %v2410_v48 = vld [vmem:[#allocation2 + $0x354] sm:$0xf]  ;;  %v2376_v53 = vld [vmem:[#allocation2 + $0x244] sm:$0xf] }
  0x66   :  { %1087 = vmatpush.bf16.msra.mxu3 %v1815_v55  ;;  %v2028_v50 = vld [vmem:[#allocation2 + $0x358] sm:$0xf0]  ;;  %v2426_v51 = vld [vmem:[#allocation2 + $0x3d4] sm:$0xf]  ;;  %v1892_v54 = vld [vmem:[#allocation2 + $0x248] sm:$0xf0]  ;;  %v1967_v55 = vor.u32 %v2394_v46, %v1964_v47 }
  0x67   :  { %1046 = vmatpush.bf16.msra.mxu0 %v1615_v56  ;;  %v2092_v52 = vld [vmem:[#allocation2 + $0x3d8] sm:$0xf0]  ;;  %v2031_v56 = vor.u32 %v2410_v48, %v2028_v50  ;;  %v2392_v58 = vld [vmem:[#allocation2 + $0x2c4] sm:$0xf]  ;;  %v1956_v59 = vld [vmem:[#allocation2 + $0x2c8] sm:$0xf0] }
  0x68   :  { %1060 = vmatpush.bf16.msra.mxu1 %v1679_v1  ;;  %v2095_v57 = vor.u32 %v2426_v51, %v2092_v52  ;;  %v2408_v60 = vld [vmem:[#allocation2 + $0x344] sm:$0xf]  ;;  %v2020_v61 = vld [vmem:[#allocation2 + $0x348] sm:$0xf0]  ;;  %v2374_v63 = vld [vmem:[#allocation2 + $0x234] sm:$0xf]  ;;  %v1959_v0 = vor.u32 %v2392_v58, %v1956_v59 }
  0x69   :  { %1074 = vmatpush.bf16.msra.mxu2 %v1743_v2  ;;  %v2424_v62 = vld [vmem:[#allocation2 + $0x3c4] sm:$0xf]  ;;  %v2023_v1 = vor.u32 %v2408_v60, %v2020_v61  ;;  %v2390_v3 = vld [vmem:[#allocation2 + $0x2b4] sm:$0xf]  ;;  %v1948_v4 = vld [vmem:[#allocation2 + $0x2b8] sm:$0xf0] }
  0x6a   :  { %1088 = vmatpush.bf16.msra.mxu3 %v1807_v6  ;;  %v2406_v5 = vld [vmem:[#allocation2 + $0x334] sm:$0xf]  ;;  %v2372_v9 = vld [vmem:[#allocation2 + $0x224] sm:$0xf]  ;;  %v1876_v10 = vld [vmem:[#allocation2 + $0x228] sm:$0xf0] }
  0x6b   :  { %1047 = vmatpush.bf16.msra.mxu0 %v1607_v7  ;;  %v2012_v7 = vld [vmem:[#allocation2 + $0x338] sm:$0xf0]  ;;  %v2422_v8 = vld [vmem:[#allocation2 + $0x3b4] sm:$0xf]  ;;  %v2388_v16 = vld [vmem:[#allocation2 + $0x2a4] sm:$0xf]  ;;  %v1879_v21 = vor.u32 %v2372_v9, %v1876_v10 }
  0x6c   :  { %1061 = vmatpush.bf16.msra.mxu1 %v1671_v22  ;;  %v2015_v14 = vor.u32 %v2406_v5, %v2012_v7  ;;  %v1940_v17 = vld [vmem:[#allocation2 + $0x2a8] sm:$0xf0]  ;;  %v2404_v18 = vld [vmem:[#allocation2 + $0x324] sm:$0xf]  ;;  %v2370_v25 = vld [vmem:[#allocation2 + $0x214] sm:$0xf] }
  0x6d   :  { %1075 = vmatpush.bf16.msra.mxu2 %v1735_v23  ;;  %v2004_v22 = vld [vmem:[#allocation2 + $0x328] sm:$0xf0]  ;;  %v2420_v23 = vld [vmem:[#allocation2 + $0x3a4] sm:$0xf]  ;;  %v2386_v30 = vld [vmem:[#allocation2 + $0x294] sm:$0xf] }
  0x6e   :  { %1089 = vmatpush.bf16.msra.mxu3 %v1799_v26  ;;  %1048 = vmatmul.bf16.vlgmr.msra.gmra.mxu0 %v2659_v12  ;;  %v2084_v12 = vld [vmem:[#allocation2 + $0x3c8] sm:$0xf0]  ;;  %v1868_v26 = vld [vmem:[#allocation2 + $0x218] sm:$0xf0]  ;;  %v2402_v32 = vld [vmem:[#allocation2 + $0x314] sm:$0xf] }
  0x6f   :  { %1096 = vmatpush.bf16.msrb.mxu0 %v1919_v11  ;;  %1062 = vmatmul.bf16.vlgmr.msra.gmra.mxu1 %v2664_v19  ;;  %v2087_v2 = vor.u32 %v2424_v62, %v2084_v12  ;;  %v2076_v19 = vld [vmem:[#allocation2 + $0x3b8] sm:$0xf0]  ;;  %v1951_v11 = vor.u32 %v2390_v3, %v1948_v4  ;;  %v2068_v24 = vld [vmem:[#allocation2 + $0x3a8] sm:$0xf0]  ;;  %v2418_v35 = vld [vmem:[#allocation2 + $0x394] sm:$0xf] }
  0x70   :  { %1110 = vmatpush.bf16.msrb.mxu1 %v1983_v27  ;;  %1076 = vmatmul.bf16.vlgmr.msra.gmra.mxu2 %v2661_v13  ;;  %v1895_v13 = vor.u32 %v2376_v53, %v1892_v54  ;;  %v2079_v15 = vor.u32 %v2422_v8, %v2076_v19  ;;  %v1943_v27 = vor.u32 %v2388_v16, %v1940_v17  ;;  %v1932_v31 = vld [vmem:[#allocation2 + $0x298] sm:$0xf0]  ;;  %v2368_v39 = vld [vmem:[#allocation2 + $0x204] sm:$0xf]  ;;  %v1860_v40 = vld [vmem:[#allocation2 + $0x208] sm:$0xf0] }
  0x71   :  { %1124 = vmatpush.bf16.msrb.mxu2 %v2047_v28  ;;  %1090 = vmatmul.bf16.vlgmr.msra.gmra.mxu3 %v2667_v20  ;;  %v1884_v20 = vld [vmem:[#allocation2 + $0x238] sm:$0xf0]  ;;  %v2007_v28 = vor.u32 %v2404_v18, %v2004_v22  ;;  %v2384_v46 = vld [vmem:[#allocation2 + $0x284] sm:$0xf]  ;;  %v1924_v47 = vld [vmem:[#allocation2 + $0x288] sm:$0xf0] }
  0x72   :  { %1138 = vmatpush.bf16.msrb.mxu3 %v2111_v29  ;;  %v1887_v6 = vor.u32 %v2374_v63, %v1884_v20  ;;  %v2071_v29 = vor.u32 %v2420_v23, %v2068_v24  ;;  %v1996_v34 = vld [vmem:[#allocation2 + $0x318] sm:$0xf0]  ;;  %v2400_v48 = vld [vmem:[#allocation2 + $0x304] sm:$0xf]  ;;  %v1988_v50 = vld [vmem:[#allocation2 + $0x308] sm:$0xf0]  ;;  %v1927_v53 = vor.u32 %v2384_v46, %v1924_v47 }
  0x73   :  { %1097 = vmatpush.bf16.msrb.mxu0 %v1911_v33  ;;  %v1871_v33 = vor.u32 %v2370_v25, %v1868_v26  ;;  %v2060_v38 = vld [vmem:[#allocation2 + $0x398] sm:$0xf0]  ;;  %v2416_v51 = vld [vmem:[#allocation2 + $0x384] sm:$0xf]  ;;  %v2052_v52 = vld [vmem:[#allocation2 + $0x388] sm:$0xf0]  ;;  %v1991_v54 = vor.u32 %v2400_v48, %v1988_v50 }
  0x74   :  { %1111 = vmatpush.bf16.msrb.mxu1 %v1975_v43  ;;  %v1935_v43 = vor.u32 %v2386_v30, %v1932_v31  ;;  %v2446_v58 = vld [vmem:[#allocation5 + $0x74] sm:$0xf]  ;;  %v2172_v60 = vld [vmem:[#allocation5 + $0x78] sm:$0xf0]  ;;  %v2162_v61 = vld [vmem:[#allocation5 + $0x60] sm:$0xf] }
  0x75   :  { %1125 = vmatpush.bf16.msrb.mxu2 %v2039_v44  ;;  %v1999_v44 = vor.u32 %v2402_v32, %v1996_v34  ;;  %v2445_v62 = vld [vmem:[#allocation5 + $0x64] sm:$0xf0]  ;;  %v2444_v12 = vld [vmem:[#allocation5 + $0x64] sm:$0xf]  ;;  %v2164_v20 = vld [vmem:[#allocation5 + $0x68] sm:$0xf0] }
  0x76   :  { %1139 = vmatpush.bf16.msrb.mxu3 %v2103_v45  ;;  %v2063_v45 = vor.u32 %v2418_v35, %v2060_v38  ;;  %v2163_v63 = vor.u32 %v2445_v62, %v2162_v61  ;;  %v2146_v3 = vld [vmem:[#allocation5 + $0x40] sm:$0xf]  ;;  %v2441_v4 = vld [vmem:[#allocation5 + $0x44] sm:$0xf0]  ;;  %v2440_v5 = vld [vmem:[#allocation5 + $0x44] sm:$0xf] }
  0x77   :  { %1098 = vmatpush.bf16.msrb.mxu0 %v1903_v49  ;;  %v1863_v49 = vor.u32 %v2368_v39, %v1860_v40  ;;  %v2148_v7 = vld [vmem:[#allocation5 + $0x48] sm:$0xf0]  ;;  %v2138_v19 = vld [vmem:[#allocation5 + $0x30] sm:$0xf]  ;;  %v2439_v9 = vld [vmem:[#allocation5 + $0x34] sm:$0xf0] }
  0x78   :  { %1112 = vmatpush.bf16.msrb.mxu1 %v1967_v55  ;;  %v2055_v55 = vor.u32 %v2416_v51, %v2052_v52  ;;  %v2151_v8 = vor.u32 %v2440_v5, %v2148_v7  ;;  %v2438_v10 = vld [vmem:[#allocation5 + $0x34] sm:$0xf]  ;;  %v2130_v16 = vld [vmem:[#allocation5 + $0x20] sm:$0xf]  ;;  %v2437_v17 = vld [vmem:[#allocation5 + $0x24] sm:$0xf0] }
  0x79   :  { %1126 = vmatpush.bf16.msrb.mxu2 %v2031_v56  ;;  %v2170_v56 = vld [vmem:[#allocation5 + $0x70] sm:$0xf]  ;;  %v2436_v18 = vld [vmem:[#allocation5 + $0x24] sm:$0xf]  ;;  %v2132_v22 = vld [vmem:[#allocation5 + $0x28] sm:$0xf0] }
  0x7a   :  { %1140 = vmatpush.bf16.msrb.mxu3 %v2095_v57  ;;  %v2447_v57 = vld [vmem:[#allocation5 + $0x74] sm:$0xf0]  ;;  %v2135_v23 = vor.u32 %v2436_v18, %v2132_v22  ;;  %v2124_v31 = vld [vmem:[#allocation5 + $0x18] sm:$0xf0]  ;;  %v2114_v34 = vld [vmem:[#allocation5] sm:$0xf] }
  0x7b   :  { %1099 = vmatpush.bf16.msrb.mxu0 %v1895_v13  ;;  %v2171_v59 = vor.u32 %v2447_v57, %v2170_v56  ;;  %v2175_v13 = vor.u32 %v2446_v58, %v2172_v60  ;;  %v2711_v24 = vld [vmem:[%s2774_s2] sm:$0x3]  ;;  %v2433_v35 = vld [vmem:[#allocation5 + $0x4] sm:$0xf0]  ;;  %v2432_v38 = vld [vmem:[#allocation5 + $0x4] sm:$0xf] }
  0x7c   :  { %1113 = vmatpush.bf16.msrb.mxu1 %v1959_v0  ;;  %v2442_v0 = vld [vmem:[#allocation5 + $0x54] sm:$0xf]  ;;  %v284_v32 = vperm.slane %v2711_v24, 0  ;;  %v2115_v40 = vor.u32 %v2433_v35, %v2114_v34  ;;  %v2463_v60 = vld [vmem:[#allocation5 + $0xf4] sm:$0xf0] }
  0x7d   :  { %1127 = vmatpush.bf16.msrb.mxu2 %v2023_v1  ;;  %v2156_v1 = vld [vmem:[#allocation5 + $0x58] sm:$0xf0]  ;;  %v2202_v34 = vld [vmem:[#allocation5 + $0xb0] sm:$0xf]  ;;  %v2455_v35 = vld [vmem:[#allocation5 + $0xb4] sm:$0xf0] }
  0x7e   :  { %1141 = vmatpush.bf16.msrb.mxu3 %v2087_v2  ;;  %v2159_v2 = vor.u32 %v2442_v0, %v2156_v1  ;;  %v2220_v22 = vld [vmem:[#allocation5 + $0xd8] sm:$0xf0] }
  0x7f   :  { %1100 = vmatpush.bf16.msrb.mxu0 %v1887_v6  ;;  %v2147_v6 = vor.u32 %v2441_v4, %v2146_v3 }
  0x80   :  { %1114 = vmatpush.bf16.msrb.mxu1 %v1951_v11  ;;  %v2139_v11 = vor.u32 %v2439_v9, %v2138_v19 }
  0x81   :  { %1128 = vmatpush.bf16.msrb.mxu2 %v2015_v14  ;;  %v2140_v14 = vld [vmem:[#allocation5 + $0x38] sm:$0xf0] }
  0x82   :  { %1142 = vmatpush.bf16.msrb.mxu3 %v2079_v15  ;;  %v2143_v15 = vor.u32 %v2438_v10, %v2140_v14 }
  0x83   :  { %1101 = vmatpush.bf16.msrb.mxu0 %v1879_v21  ;;  %v2131_v21 = vor.u32 %v2437_v17, %v2130_v16  ;;  %v2459_v16 = vld [vmem:[#allocation5 + $0xd4] sm:$0xf0]  ;;  %v2458_v17 = vld [vmem:[#allocation5 + $0xd4] sm:$0xf] }
  0x84   :  { %1115 = vmatpush.bf16.msrb.mxu1 %v1943_v27  ;;  %v2122_v27 = vld [vmem:[#allocation5 + $0x10] sm:$0xf] }
  0x85   :  { %1129 = vmatpush.bf16.msrb.mxu2 %v2007_v28  ;;  %v2435_v28 = vld [vmem:[#allocation5 + $0x14] sm:$0xf0] }
  0x86   :  { %1143 = vmatpush.bf16.msrb.mxu3 %v2071_v29  ;;  %v2434_v29 = vld [vmem:[#allocation5 + $0x14] sm:$0xf]  ;;  %v2123_v30 = vor.u32 %v2435_v28, %v2122_v27  ;;  %v2456_v27 = vld [vmem:[#allocation5 + $0xc4] sm:$0xf]  ;;  %v2212_v28 = vld [vmem:[#allocation5 + $0xc8] sm:$0xf0] }
  0x87   :  { %1102 = vmatpush.bf16.msrb.mxu0 %v1871_v33  ;;  %v2127_v33 = vor.u32 %v2434_v29, %v2124_v31 }
  0x88   :  { %1116 = vmatpush.bf16.msrb.mxu1 %v1935_v43  ;;  %v2116_v43 = vld [vmem:[#allocation5 + $0x8] sm:$0xf0] }
  0x89   :  { %1130 = vmatpush.bf16.msrb.mxu2 %v1999_v44  ;;  %v2119_v46 = vor.u32 %v2432_v38, %v2116_v43  ;;  %v2454_v38 = vld [vmem:[#allocation5 + $0xb4] sm:$0xf]  ;;  %v2204_v43 = vld [vmem:[#allocation5 + $0xb8] sm:$0xf0] }
  0x8a   :  { %1144 = vmatpush.bf16.msrb.mxu3 %v2063_v45 }
  0x8b   :  { %1103 = vmatpush.bf16.msrb.mxu0 %v1863_v49 }
  0x8c   :  { %1117 = vmatpush.bf16.msrb.mxu1 %v1927_v53 }
  0x8d   :  { %1131 = vmatpush.bf16.msrb.mxu2 %v1991_v54 }
  0x8e   :  { %1145 = vmatpush.bf16.msrb.mxu3 %v2055_v55  ;;  %1104 = vmatmul.bf16.vlgmr.msrb.gmra.mxu0 %v2687_v36  ;;  %v2167_v36 = vor.u32 %v2444_v12, %v2164_v20  ;;  %v2236_v12 = vld [vmem:[#allocation5 + $0xf8] sm:$0xf0]  ;;  %v2461_v20 = vld [vmem:[#allocation5 + $0xe4] sm:$0xf0] }
  0x8f   :  { %1118 = vmatmul.bf16.vlgmr.msrb.gmra.mxu1 %v2692_v41  ;;  %1356 = vmatpush.bf16.msra.mxu0 %v2171_v59  ;;  %v2154_v41 = vld [vmem:[#allocation5 + $0x50] sm:$0xf] }
  0x90   :  { %1132 = vmatmul.bf16.vlgmr.msrb.gmra.mxu2 %v2689_v37  ;;  %v2443_v37 = vld [vmem:[#allocation5 + $0x54] sm:$0xf0]  ;;  %v2234_v59 = vld [vmem:[#allocation5 + $0xf0] sm:$0xf] }
  0x91   :  { %1146 = vmatmul.bf16.vlgmr.msrb.gmra.mxu3 %v2694_v42  ;;  %1384 = vmatpush.bf16.msra.mxu2 %v2175_v13  ;;  %v2155_v42 = vor.u32 %v2443_v37, %v2154_v41  ;;  %v2462_v13 = vld [vmem:[#allocation5 + $0xf4] sm:$0xf]  ;;  %v2235_v62 = vor.u32 %v2463_v60, %v2234_v59  ;;  %v2460_v41 = vld [vmem:[#allocation5 + $0xe4] sm:$0xf]  ;;  %v2228_v37 = vld [vmem:[#allocation5 + $0xe8] sm:$0xf0] }
  0x92   :  { %v2188_v60 = vld [vmem:[#allocation5 + $0x98] sm:$0xf0] }
  0x93   :  { %1357 = vmatpush.bf16.msra.mxu0 %v2163_v63  ;;  %v2226_v63 = vld [vmem:[#allocation5 + $0xe0] sm:$0xf]  ;;  %1370 = vmatpush.bf16.msra.mxu1 %v2235_v62 }
  0x95   :  { %1385 = vmatpush.bf16.msra.mxu2 %v2167_v36  ;;  %v2239_v36 = vor.u32 %v2462_v13, %v2236_v12  ;;  %v2178_v13 = vld [vmem:[#allocation5 + $0x80] sm:$0xf] }
  0x97   :  { %1358 = vmatpush.bf16.msra.mxu0 %v2155_v42  ;;  %v2227_v42 = vor.u32 %v2461_v20, %v2226_v63  ;;  %1398 = vmatpush.bf16.msra.mxu3 %v2239_v36  ;;  %v2448_v63 = vld [vmem:[#allocation5 + $0x84] sm:$0xf]  ;;  %v2180_v20 = vld [vmem:[#allocation5 + $0x88] sm:$0xf0] }
  0x99   :  { %1386 = vmatpush.bf16.msra.mxu2 %v2159_v2  ;;  %v2231_v2 = vor.u32 %v2460_v41, %v2228_v37  ;;  %1371 = vmatpush.bf16.msra.mxu1 %v2227_v42  ;;  %v2183_v41 = vor.u32 %v2448_v63, %v2180_v20 }
  0x9b   :  { %1359 = vmatpush.bf16.msra.mxu0 %v2147_v6  ;;  %1399 = vmatpush.bf16.msra.mxu3 %v2231_v2 }
  0x9d   :  { %1387 = vmatpush.bf16.msra.mxu2 %v2151_v8 }
  0x9f   :  { %1360 = vmatpush.bf16.msra.mxu0 %v2139_v11 }
  0xa1   :  { %1388 = vmatpush.bf16.msra.mxu2 %v2143_v15  ;;  %v2218_v15 = vld [vmem:[#allocation5 + $0xd0] sm:$0xf] }
  0xa3   :  { %1361 = vmatpush.bf16.msra.mxu0 %v2131_v21  ;;  %v2219_v21 = vor.u32 %v2459_v16, %v2218_v15 }
  0xa5   :  { %1389 = vmatpush.bf16.msra.mxu2 %v2135_v23  ;;  %v2210_v23 = vld [vmem:[#allocation5 + $0xc0] sm:$0xf]  ;;  %1372 = vmatpush.bf16.msra.mxu1 %v2219_v21 }
  0xa7   :  { %1362 = vmatpush.bf16.msra.mxu0 %v2123_v30 }
  0xa9   :  { %1390 = vmatpush.bf16.msra.mxu2 %v2127_v33 }
  0xab   :  { %1363 = vmatpush.bf16.msra.mxu0 %v2115_v40  ;;  %v2203_v40 = vor.u32 %v2455_v35, %v2202_v34  ;;  %v2469_v34 = vld [vmem:[%s2777_s5 + $0x28] sm:$0xff] }
  0xac   :  { %v2477_v35 = vld [vmem:[%s2777_s5 + $0x68] sm:$0xff] }
  0xad   :  { %1391 = vmatpush.bf16.msra.mxu2 %v2119_v46  ;;  %v2207_v46 = vor.u32 %v2454_v38, %v2204_v43  ;;  %v2468_v38 = vld [vmem:[%s2777_s5 + $0x20] sm:$0xff]  ;;  %v2466_v43 = vld [vmem:[%s2777_s5 + $0x10] sm:$0xff] }
  0xc1   :  { %v937_v25 = vpop.f32.mrf.mxu0 }
  0xc2   :  { %v951_v26 = vpop.f32.mrf.mxu1  ;;  %v938_v44 = vadd.f32 %v937_v25, %v284_v32  ;;  %v2457_v25 = vld [vmem:[#allocation5 + $0xc4] sm:$0xf0] }
  0xc3   :  { %v2211_v31 = vor.u32 %v2457_v25, %v2210_v23 }
  0xc4   :  { %v952_v48 = vadd.f32 %v951_v26, %v938_v44  ;;  %v2223_v26 = vor.u32 %v2458_v17, %v2220_v22  ;;  %v2194_v44 = vld [vmem:[#allocation5 + $0xa0] sm:$0xf] }
  0xc5   :  { %1373 = vmatpush.bf16.msra.mxu1 %v2211_v31  ;;  %v2479_v31 = vld [vmem:[%s2777_s5 + $0x78] sm:$0xff] }
  0xc6   :  { %v965_v39 = vpop.f32.mrf.mxu2  ;;  %1400 = vmatpush.bf16.msra.mxu3 %v2223_v26 }
  0xc7   :  { %v966_v51 = vadd.f32 %v965_v39, %v952_v48  ;;  %v2196_v48 = vld [vmem:[#allocation5 + $0xa8] sm:$0xf0] }
  0xc9   :  { %v939_v47 = vpop.f32.mrf.mxu0  ;;  %1374 = vmatpush.bf16.msra.mxu1 %v2203_v40  ;;  %v2476_v40 = vld [vmem:[%s2777_s5 + $0x60] sm:$0xff] }
  0xca   :  { %v979_v45 = vpop.f32.mrf.mxu3  ;;  %v953_v49 = vpop.f32.mrf.mxu1  ;;  %v940_v50 = vadd.f32 %v939_v47, %v284_v32  ;;  %v2215_v32 = vor.u32 %v2456_v27, %v2212_v28  ;;  %v2452_v47 = vld [vmem:[#allocation5 + $0xa4] sm:$0xf] }
  0xcb   :  { %v980_v55 = vadd.f32 %v979_v45, %v966_v51  ;;  %v2453_v45 = vld [vmem:[#allocation5 + $0xa4] sm:$0xf0] }
  0xcc   :  { %v954_v53 = vadd.f32 %v953_v49, %v940_v50  ;;  %1401 = vmatpush.bf16.msra.mxu3 %v2215_v32  ;;  %v2195_v49 = vor.u32 %v2453_v45, %v2194_v44  ;;  %v2199_v50 = vor.u32 %v2452_v47, %v2196_v48  ;;  %v2470_v32 = vld [vmem:[%s2777_s5 + $0x30] sm:$0xff]  ;;  %v2475_v44 = vld [vmem:[%s2777_s5 + $0x58] sm:$0xff]  ;;  %v2465_v45 = vld [vmem:[%s2777_s5 + $0x8] sm:$0xff] }
  0xcd   :  { %v2464_v47 = vld [vmem:[%s2777_s5] sm:$0xff]  ;;  %v2473_v48 = vld [vmem:[%s2777_s5 + $0x48] sm:$0xff] }
  0xce   :  { %v967_v52 = vpop.f32.mrf.mxu2  ;;  %1375 = vmatpush.bf16.msra.mxu1 %v2195_v49  ;;  %v2472_v49 = vld [vmem:[%s2777_s5 + $0x40] sm:$0xff] }
  0xcf   :  { %v968_v57 = vadd.f32 %v967_v52, %v954_v53  ;;  %v285_v52 = vperm.slane %v2711_v24, 1 }
  0xd0   :  { %1402 = vmatpush.bf16.msra.mxu3 %v2207_v46  ;;  %v2474_v46 = vld [vmem:[%s2777_s5 + $0x50] sm:$0xff] }
  0xd2   :  { %v981_v54 = vpop.f32.mrf.mxu3 }
  0xd3   :  { %v982_v0 = vadd.f32 %v981_v54, %v968_v57  ;;  %v2450_v57 = vld [vmem:[#allocation5 + $0x94] sm:$0xf] }
  0xd4   :  { %1403 = vmatpush.bf16.msra.mxu3 %v2199_v50  ;;  %v2191_v12 = vor.u32 %v2450_v57, %v2188_v60 }
  0xd8   :  { %1404 = vmatpush.bf16.msra.mxu3 %v2191_v12 }
  0xd9   :  { %v993_v56 = vpop.f32.mrf.mxu0 }
  0xda   :  { %v1007_v58 = vpop.f32.mrf.mxu1  ;;  %v994_v61 = vadd.f32 %v993_v56, %v980_v55  ;;  %v2186_v55 = vld [vmem:[#allocation5 + $0x90] sm:$0xf]  ;;  %v2451_v56 = vld [vmem:[#allocation5 + $0x94] sm:$0xf0] }
  0xdb   :  { %v2187_v59 = vor.u32 %v2451_v56, %v2186_v55 }
  0xdc   :  { %v1008_v3 = vadd.f32 %v1007_v58, %v994_v61  ;;  %v2449_v61 = vld [vmem:[#allocation5 + $0x84] sm:$0xf0]  ;;  %1405 = vmatpush.bf16.msra.mxu3 %v2183_v41 }
  0xdd   :  { %1376 = vmatpush.bf16.msra.mxu1 %v2187_v59  ;;  %v2179_v36 = vor.u32 %v2449_v61, %v2178_v13 }
  0xde   :  { %v1021_v1 = vpop.f32.mrf.mxu2 }
  0xdf   :  { %v1022_v8 = vadd.f32 %v1021_v1, %v1008_v3 }
  0xe1   :  { %v995_v5 = vpop.f32.mrf.mxu0  ;;  %1377 = vmatpush.bf16.msra.mxu1 %v2179_v36 }
  0xe2   :  { %v1035_v4 = vpop.f32.mrf.mxu3  ;;  %v996_v6 = vadd.f32 %v995_v5, %v982_v0  ;;  %v1009_v7 = vpop.f32.mrf.mxu1 }
  0xe3   :  { %v1036_v10 = vadd.f32 %v1035_v4, %v1022_v8 }
  0xe4   :  { %v1010_v19 = vadd.f32 %v1009_v7, %v996_v6 }
  0xe5   :  { %v1152_v29 = vmax.f32 %v1036_v10, 0.0  ;;  %1564 = vmatpush.bf16.msrb.mxu1 %v2479_v31 }
  0xe6   :  { %v1023_v9 = vpop.f32.mrf.mxu2 }
  0xe7   :  { %v1024_v11 = vadd.f32 %v1023_v9, %v1010_v19 }
  0xea   :  { %v1037_v14 = vpop.f32.mrf.mxu3 }
  0xeb   :  { %v1038_v18 = vadd.f32 %v1037_v14, %v1024_v11  ;;  %v1049_v39 = vpop.f32.mrf.mxu0 }
  0xec   :  { %v1063_v51 = vpop.f32.mrf.mxu1  ;;  %v1050_v62 = vadd.f32 %v1049_v39, %v285_v52  ;;  %v2467_v39 = vld [vmem:[%s2777_s5 + $0x18] sm:$0xff] }
  0xed   :  { %v1154_v30 = vmax.f32 %v1038_v18, 0.0 }
  0xee   :  { %v1064_v37 = vadd.f32 %v1063_v51, %v1050_v62  ;;  %v1190_v51 = vld [vmem:[%s2776_s4] sm:$0x3] }
  0xef   :  { %v1156_v33 = vpack.c.bf16 %v1154_v30, %v1152_v29  ;;  %v2471_v30 = vld [vmem:[%s2777_s5 + $0x38] sm:$0xff] }
  0xf0   :  { %1550 = vmatpush.bf16.msrb.mxu0 %v2471_v30 }
  0xf1   :  { %1364 = vmatmul.bf16.vlgmr.msra.gmra.mxu0 %v1156_v33  ;;  %1392 = vmatmul.bf16.vlgmr.msra.gmra.mxu2 %v1156_v33  ;;  %v2478_v33 = vld [vmem:[%s2777_s5 + $0x70] sm:$0xff] }
  0xf2   :  { %1565 = vmatpush.bf16.msrb.mxu1 %v2478_v33 }
  0xf3   :  { %v1077_v53 = vpop.f32.mrf.mxu2  ;;  %v1051_v58 = vpop.f32.mrf.mxu0 }
  0xf4   :  { %v1091_v54 = vpop.f32.mrf.mxu3  ;;  %v1065_v24 = vpop.f32.mrf.mxu1  ;;  %v1052_v0 = vadd.f32 %v1051_v58, %v285_v52  ;;  %v1078_v3 = vadd.f32 %v1077_v53, %v1064_v37  ;;  %1551 = vmatpush.bf16.msrb.mxu0 %v2470_v32  ;;  %v1193_v58 = vperm.slane %v1190_v51, 1 }
  0xf6   :  { %v1066_v4 = vadd.f32 %v1065_v24, %v1052_v0  ;;  %v1092_v6 = vadd.f32 %v1091_v54, %v1078_v3  ;;  %1566 = vmatpush.bf16.msrb.mxu1 %v2477_v35  ;;  %v1192_v54 = vperm.slane %v1190_v51, 0 }
  0xf8   :  { %1552 = vmatpush.bf16.msrb.mxu0 %v2469_v34 }
  0xfa   :  { %1567 = vmatpush.bf16.msrb.mxu1 %v2476_v40 }
  0xfb   :  { %v1079_v42 = vpop.f32.mrf.mxu2 }
  0xfc   :  { %v1093_v1 = vpop.f32.mrf.mxu3  ;;  %v1080_v7 = vadd.f32 %v1079_v42, %v1066_v4  ;;  %1553 = vmatpush.bf16.msrb.mxu0 %v2468_v38  ;;  %v2487_v4 = vld [vmem:[%s2778_s6] ss:$0 sm:$0xff] }
  0xfe   :  { %v1094_v10 = vadd.f32 %v1093_v1, %v1080_v7  ;;  %1568 = vmatpush.bf16.msrb.mxu1 %v2475_v44 }
 0x100   :  { %1554 = vmatpush.bf16.msrb.mxu0 %v2467_v39 }
 0x102   :  { %1569 = vmatpush.bf16.msrb.mxu1 %v2474_v46 }
 0x104   :  { %1555 = vmatpush.bf16.msrb.mxu0 %v2466_v43 }
 0x106   :  { %1570 = vmatpush.bf16.msrb.mxu1 %v2473_v48 }
 0x108   :  { %1556 = vmatpush.bf16.msrb.mxu0 %v2465_v45 }
 0x10a   :  { %1571 = vmatpush.bf16.msrb.mxu1 %v2472_v49 }
 0x10b   :  { %v1105_v2 = vpop.f32.mrf.mxu0 }
 0x10c   :  { %v1119_v5 = vpop.f32.mrf.mxu1  ;;  %v1106_v8 = vadd.f32 %v1105_v2, %v1092_v6  ;;  %1557 = vmatpush.bf16.msrb.mxu0 %v2464_v47 }
 0x10e   :  { %v1120_v14 = vadd.f32 %v1119_v5, %v1106_v8 }
 0x113   :  { %v1133_v19 = vpop.f32.mrf.mxu2  ;;  %v1107_v11 = vpop.f32.mrf.mxu0 }
 0x114   :  { %v1147_v9 = vpop.f32.mrf.mxu3  ;;  %v1108_v15 = vadd.f32 %v1107_v11, %v1094_v10  ;;  %v1134_v16 = vadd.f32 %v1133_v19, %v1120_v14  ;;  %v1121_v17 = vpop.f32.mrf.mxu1 }
 0x116   :  { %v1122_v18 = vadd.f32 %v1121_v17, %v1108_v15  ;;  %v1148_v22 = vadd.f32 %v1147_v9, %v1134_v16 }
 0x118   :  { %v1153_v27 = vmax.f32 %v1148_v22, 0.0 }
 0x11b   :  { %v1135_v21 = vpop.f32.mrf.mxu2 }
 0x11c   :  { %v1136_v23 = vadd.f32 %v1135_v21, %v1122_v18  ;;  %v1149_v25 = vpop.f32.mrf.mxu3 }
 0x11e   :  { %v1150_v26 = vadd.f32 %v1149_v25, %v1136_v23 }
 0x120   :  { %v1155_v28 = vmax.f32 %v1150_v26, 0.0 }
 0x122   :  { %v1157_v29 = vpack.c.bf16 %v1155_v28, %v1153_v27 }
 0x124   :  { %1378 = vmatmul.bf16.vlgmr.msra.gmra.mxu1 %v1157_v29  ;;  %1406 = vmatmul.bf16.vlgmr.msra.gmra.mxu3 %v1157_v29 }
 0x16e   :  { %v1365_v50 = vpop.f32.mrf.mxu0 }
 0x16f   :  { %v1366_v56 = vadd.f32 %v1365_v50, %v1192_v54 }
 0x174   :  { %v1393_v52 = vpop.f32.mrf.mxu2 }
 0x175   :  { %v1394_v12 = vadd.f32 %v1393_v52, %v1193_v58 }
 0x176   :  { %v1367_v55 = vpop.f32.mrf.mxu0 }
 0x177   :  { %v1368_v59 = vadd.f32 %v1367_v55, %v1192_v54 }
 0x17c   :  { %v1395_v62 = vpop.f32.mrf.mxu2 }
 0x17d   :  { %v1396_v36 = vadd.f32 %v1395_v62, %v1193_v58 }
 0x1a1   :  { %v1379_v53 = vpop.f32.mrf.mxu1 }
 0x1a2   :  { %v1380_v60 = vadd.f32 %v1379_v53, %v1366_v56 }
 0x1a4   :  { %v1412_v63 = vmax.f32 %v1380_v60, 0.0 }
 0x1a7   :  { %v1407_v57 = vpop.f32.mrf.mxu3 }
 0x1a8   :  { %v1408_v41 = vadd.f32 %v1407_v57, %v1394_v12 }
 0x1a9   :  { %v1381_v13 = vpop.f32.mrf.mxu1 }
 0x1aa   :  { %v1382_v61 = vadd.f32 %v1381_v13, %v1368_v59  ;;  %v1413_v42 = vmax.f32 %v1408_v41, 0.0 }
 0x1ac   :  { %v1414_v20 = vmax.f32 %v1382_v61, 0.0 }
 0x1ae   :  { %v1416_v24 = vpack.c.bf16 %v1414_v20, %v1412_v63 }
 0x1af   :  { %v1409_v37 = vpop.f32.mrf.mxu3 }
 0x1b0   :  { %v1410_v0 = vadd.f32 %v1409_v37, %v1396_v36  ;;  %1558 = vmatmul.bf16.vlgmr.msrb.gmra.mxu0 %v1416_v24 }
 0x1b2   :  { %v1415_v1 = vmax.f32 %v1410_v0, 0.0 }
 0x1b4   :  { %v1417_v2 = vpack.c.bf16 %v1415_v1, %v1413_v42 }
 0x1b6   :  { %1572 = vmatmul.bf16.vlgmr.msrb.gmra.mxu1 %v1417_v2 }
 0x22d   :  { %v1559_v3 = vpop.f32.mrf.mxu0 }
 0x22e   :  { %v1560_v5 = vadd.f32 %v2487_v4, %v1559_v3 }
 0x233   :  { %v1573_v6 = vpop.f32.mrf.mxu1 }
 0x234   :  { %v1574_v7 = vadd.f32 %v1573_v6, %v1560_v5 }
 0x235   :  { %v1561_v8 = vpop.f32.mrf.mxu0 }
 0x236   :  { %1578 = vst [vmem:[#allocation7] sm:$0xff] %v1574_v7  ;;  %v1562_v19 = vadd.f32 %v2487_v4, %v1561_v8 }
 0x23b   :  { %v1575_v9 = vpop.f32.mrf.mxu1 }
 0x23c   :  { %v1576_v10 = vadd.f32 %v1575_v9, %v1562_v19 }
 0x23e   :  { %1579 = vst [vmem:[#allocation7 + $0x8] sm:$0xff] %v1576_v10 }
 0x23f   :  { %1583 = vsyncadd [#allocation4], 224  ;;  %s1586_s27 = sshll.u32 %s2779_s7, 4  ;;  %s2570_s28 = smov [#allocation7]   ;;  %s1587_s27 = int_to_ptr.hbm [resolvable:$true] %s1586_s27 }
 0x240   :  { %s1584_s29 = sshll.u32 %s2570_s28, 4  ;;  %s2571_s30 = smov 32   ;;  %s1585_s29 = int_to_ptr.vmem [resolvable:$true] %s1584_s29 }
 0x241   :  { %s2572_s6 = smov 2  }
 0x242   :  { %1592 = dma.vmem_to_hbm [thread:$0]  %s1585_s29, 32, %s1587_s27, [#allocation4], %s2571_s30, %s2571_s30, %s2572_s6  }
 0x243   :  { %2564 = dma.done.wait [#allocation4], 256  }
 0x244   :  { %2565 = vsyncadd [#allocation4], 4294967040 }
 0x245   :  { %1597 = vsyncpa [#allocation3], 1 }
 0x246   :  { %1598 = vsyncpa [#allocation6], 1 }
 0x247   :  { %1599 = vsyncpa [#allocation4], 1 }

</bundles_post_ra>
